<compile_context>
chip_gen: v7x
topology: tpu7x:2x2x1
jax: 0.10.0
libtpu: 0.0.40
codegen_flags: <defaults>
</compile_context>

<pallas_src>
import functools

import jax
import jax.numpy as jnp
from jax.experimental import pallas as pl
from jax.experimental.pallas import tpu as pltpu

EPS = 1e-5

# Sublane-aligned offsets of the packed per-feature column parameters.
_G1, _BE1, _G2, _BE2, _W3, _B3, _PACKED = 0, 64, 128, 160, 192, 224, 232


def _bn_finalize(k_ref, s_ref, v_ref, gamma, beta, inv_b):
    """Turn accumulated shifted sums into a fused affine (scale, shift).

    mean = k + sum(d)/B, var = sum(d^2)/B - (sum(d)/B)^2 with d = h - k and
    k ~= mean (tile-0 batch mean), so the one-pass form has no catastrophic
    cancellation.  Overwrites s_ref <- scale, v_ref <- shift so each
    normalize pass is a single fused multiply-add per element.
    """
    d_mean = s_ref[...] * inv_b
    var = jnp.maximum(v_ref[...] * inv_b - d_mean * d_mean, 0.0)
    mean = k_ref[...] + d_mean
    scale = gamma * jax.lax.rsqrt(var + EPS)
    s_ref[...] = scale
    v_ref[...] = beta - mean * scale


def _make_kernel(batch, tile_b):
    """Build the 3-phase kernel, closing over static batch / tile sizes."""
    inv_b = 1.0 / batch
    partial_tile = (batch % tile_b) != 0
    n_valid0 = min(batch, tile_b)          # valid lanes in batch tile 0

    def kernel(x_ref, w1_ref, w2_ref, pk_ref, o_ref,
               k1_ref, s1_ref, v1_ref, k2_ref, s2_ref, v2_ref):
        # Scratch (persists across grid steps):
        #   k*_ref : per-feature shift (tile-0 batch mean)
        #   s*_ref : phases 0/1: sum(h-k)    -> after finalize: BN scale
        #   v*_ref : phases 0/1: sum((h-k)^2)-> after finalize: BN shift
        p = pl.program_id(0)               # phase: 0 bn1-stats, 1 bn2-stats, 2 emit
        t = pl.program_id(1)               # batch tile (fastest axis)

        if partial_tile:
            lane = jax.lax.broadcasted_iota(jnp.int32, (1, tile_b), 1)
            valid = (t * tile_b + lane) < batch
            masked = lambda v: jnp.where(valid, v, 0.0)
        else:
            masked = lambda v: v

        # fc1 with the feature dim contracted directly against (TB, F_in) x —
        # no wrapper-side HBM transpose.  fc1/fc2 biases are dropped: training-
        # mode BN subtracts the batch mean, so a pre-BN bias cancels exactly.
        # Result is feature-major [64, TB]: batch on lanes -> lane-dense BN /
        # ReLU / affine work and a lane-dense output row.
        h1 = jax.lax.dot_general(
            w1_ref[...], x_ref[...], (((1,), (1,)), ((), ())),
            preferred_element_type=jnp.float32)                    # [64, TB]

        # ---------------- phase 0: accumulate bn1 statistics ----------------
        @pl.when(p == 0)
        def _():
            @pl.when(t == 0)
            def _():
                k1_ref[...] = (jnp.sum(masked(h1), axis=1, keepdims=True)
                               * (1.0 / n_valid0))
                s1_ref[...] = jnp.zeros_like(s1_ref)
                v1_ref[...] = jnp.zeros_like(v1_ref)
            d = masked(h1 - k1_ref[...])
            s1_ref[...] += jnp.sum(d, axis=1, keepdims=True)
            v1_ref[...] += jnp.sum(d * d, axis=1, keepdims=True)

        # --------- phase 1: finalize bn1, accumulate bn2 statistics ---------
        @pl.when(p == 1)
        def _():
            @pl.when(t == 0)
            def _():
                _bn_finalize(k1_ref, s1_ref, v1_ref,
                             pk_ref[_G1:_BE1, :], pk_ref[_BE1:_G2, :], inv_b)
            a1 = jnp.maximum(h1 * s1_ref[...] + v1_ref[...], 0.0)   # bn1+relu
            h2 = jnp.dot(w2_ref[...], a1,
                         preferred_element_type=jnp.float32)        # [32, TB]

            @pl.when(t == 0)
            def _():
                k2_ref[...] = (jnp.sum(masked(h2), axis=1, keepdims=True)
                               * (1.0 / n_valid0))
                s2_ref[...] = jnp.zeros_like(s2_ref)
                v2_ref[...] = jnp.zeros_like(v2_ref)
            d = masked(h2 - k2_ref[...])
            s2_ref[...] += jnp.sum(d, axis=1, keepdims=True)
            v2_ref[...] += jnp.sum(d * d, axis=1, keepdims=True)

        # ----- phase 2: finalize bn2, normalize + relu + fc3 + sigmoid ------
        @pl.when(p == 2)
        def _():
            @pl.when(t == 0)
            def _():
                _bn_finalize(k2_ref, s2_ref, v2_ref,
                             pk_ref[_G2:_BE2, :], pk_ref[_BE2:_W3, :], inv_b)
            a1 = jnp.maximum(h1 * s1_ref[...] + v1_ref[...], 0.0)
            h2 = jnp.dot(w2_ref[...], a1, preferred_element_type=jnp.float32)
            a2 = jnp.maximum(h2 * s2_ref[...] + v2_ref[...], 0.0)
            # fc3 (32 -> 1): skip the MXU, VPU multiply + sublane reduce.
            w3 = pk_ref[_W3:_B3, :]
            b3 = pk_ref[_B3:_B3 + 1, :]
            h3 = jnp.sum(a2 * w3, axis=0, keepdims=True) + b3       # [1, TB]
            o_ref[...] = jax.nn.sigmoid(h3)

    return kernel


def _pick_tile_b(batch):
    # Lane-aligned batch tile: big enough to amortize the ~0.35 us/grid-step
    # overhead and keep the (1, TB) output store lane-dense, small enough that
    # live buffers (~0.5 KiB of VMEM per in-flight batch element) stay far
    # below v7x's 64 MiB VMEM and the 16/32 MiB default scoped limits.
    tb = ((batch + 127) // 128) * 128
    return max(128, min(tb, 4096))


@functools.partial(jax.jit, static_argnames=("tile_b",))
def neuralnet_forward(x, params, *, tile_b=None):
    batch, f_in = x.shape
    tb = tile_b if tile_b is not None else _pick_tile_b(batch)
    assert tb % 128 == 0, "batch tile must be lane-aligned"
    n_tiles = pl.cdiv(batch, tb)

    grid_spec = pltpu.PrefetchScalarGridSpec(
        num_scalar_prefetch=0,
        grid=(3, n_tiles),                                    # (phase, batch tile)
        in_specs=[
            pl.BlockSpec((tb, f_in), lambda p, t: (t, 0)),    # x: streamed per tile
            pl.BlockSpec((64, f_in), lambda p, t: (0, 0)),    # w1: resident
            pl.BlockSpec((32, 64), lambda p, t: (0, 0)),      # w2: resident
            pl.BlockSpec((_PACKED, 1), lambda p, t: (0, 0)),  # packed small params
        ],
        out_specs=pl.BlockSpec((1, tb), lambda p, t: (0, t)), # lane-dense row
        scratch_shapes=[
            pltpu.VMEM((64, 1), jnp.float32),   # k1: bn1 shift (tile-0 mean)
            pltpu.VMEM((64, 1), jnp.float32),   # s1: sum(d)   -> bn1 scale
            pltpu.VMEM((64, 1), jnp.float32),   # v1: sum(d^2) -> bn1 shift
            pltpu.VMEM((32, 1), jnp.float32),   # k2
            pltpu.VMEM((32, 1), jnp.float32),   # s2 -> bn2 scale
            pltpu.VMEM((32, 1), jnp.float32),   # v2 -> bn2 shift
        ],
    )

    out_row = pl.pallas_call(
        _make_kernel(batch, tb),
        out_shape=jax.ShapeDtypeStruct((1, batch), jnp.float32),
        grid_spec=grid_spec,
        compiler_params=pltpu.CompilerParams(
            # BN statistics accumulate across batch tiles in core-private
            # scratch, so both axes stay "arbitrary" (sequential).
            dimension_semantics=("arbitrary", "arbitrary"),
        ),
    )(x, params["w1"], params["w2"], params["packed"])

    # (1, B) -> (B, 1): a dim-1 transpose is a pure reshape (no data movement).
    return out_row.reshape(batch, 1)


def pack_small_params(p):
    cols = [
        p["g1"].reshape(64, 1), p["be1"].reshape(64, 1),
        p["g2"].reshape(32, 1), p["be2"].reshape(32, 1),
        p["w3"].reshape(32, 1), p["b3"].reshape(1, 1),
    ]
    packed = jnp.concatenate(cols, axis=0).astype(jnp.float32)     # (225, 1)
    return jnp.pad(packed, ((0, _PACKED - packed.shape[0]), (0, 0)))


def init_params(key, input_size):
    """PyTorch-default init: uniform +-1/sqrt(fan_in), weights (out, in)."""
    ks = jax.random.split(key, 6)

    def lin(kw, kb, fan_in, fan_out):
        bound = 1.0 / (fan_in ** 0.5)
        w = jax.random.uniform(kw, (fan_out, fan_in), jnp.float32, -bound, bound)
        b = jax.random.uniform(kb, (fan_out,), jnp.float32, -bound, bound)
        return w, b

    w1, b1 = lin(ks[0], ks[1], input_size, 64)
    w2, b2 = lin(ks[2], ks[3], 64, 32)
    w3, b3 = lin(ks[4], ks[5], 32, 1)
    p = {
        "w1": w1, "b1": b1,
        "g1": jnp.ones((64,), jnp.float32), "be1": jnp.zeros((64,), jnp.float32),
        "w2": w2, "b2": b2,
        "g2": jnp.ones((32,), jnp.float32), "be2": jnp.zeros((32,), jnp.float32),
        "w3": w3, "b3": b3,
    }
    p["packed"] = pack_small_params(p)
    return p


def _reference(xr, p):
    """Pure-JAX reference with exact PyTorch semantics (INCLUDING fc1/fc2
    biases, which the kernel drops because training-mode BN cancels them)."""
    def bn(h, g, b):
        m = h.mean(0, keepdims=True)
        v = ((h - m) ** 2).mean(0, keepdims=True)
        return (h - m) / jnp.sqrt(v + EPS) * g + b
    h = xr @ p["w1"].T + p["b1"]
    h = jnp.maximum(bn(h, p["g1"], p["be1"]), 0.0)
    h = h @ p["w2"].T + p["b2"]
    h = jnp.maximum(bn(h, p["g2"], p["be2"]), 0.0)
    h = h @ p["w3"].T + p["b3"]
    return jax.nn.sigmoid(h)


if __name__ == "__main__":
    key = jax.random.PRNGKey(0)
    k_x, k_x2, k_p = jax.random.split(key, 3)

    input_size = 16
    params = init_params(k_p, input_size)

    # Small batch: single (partial) tile, exercises the lane-mask path.
    x_small = jax.random.normal(k_x, (8, input_size), jnp.float32)
    out_small = neuralnet_forward(x_small, params)
    jax.block_until_ready(out_small)
    assert out_small.shape == (8, 1)
    assert jnp.allclose(out_small, _reference(x_small, params), atol=1e-5), \
        "mismatch vs reference (B=8)"

    # Multi-tile batch with a partial last tile: exercises cross-tile BN
    # statistics accumulation and the masked store path (tile forced small).
    x_big = jax.random.normal(k_x2, (200, input_size), jnp.float32)
    out_big = neuralnet_forward(x_big, params, tile_b=128)
    jax.block_until_ready(out_big)
    assert out_big.shape == (200, 1)
    assert jnp.allclose(out_big, _reference(x_big, params), atol=2e-5), \
        "mismatch vs reference (B=200, tiled)"

    print("KERNEL_OK")
</pallas_src>

<mosaic_0001>
module attributes {stable_mosaic.version = 11 : i64} {
  func.func @kernel(%arg0: i32, %arg1: i32, %arg2: memref<128x16xf32, #tpu.memory_space<vmem>>, %arg3: memref<64x16xf32, #tpu.memory_space<vmem>>, %arg4: memref<32x64xf32, #tpu.memory_space<vmem>>, %arg5: memref<232x1xf32, #tpu.memory_space<vmem>>, %arg6: memref<1x128xf32, #tpu.memory_space<vmem>>, %arg7: memref<64x1xf32, #tpu.memory_space<vmem>>, %arg8: memref<64x1xf32, #tpu.memory_space<vmem>>, %arg9: memref<64x1xf32, #tpu.memory_space<vmem>>, %arg10: memref<32x1xf32, #tpu.memory_space<vmem>>, %arg11: memref<32x1xf32, #tpu.memory_space<vmem>>, %arg12: memref<32x1xf32, #tpu.memory_space<vmem>>) attributes {dimension_semantics = [#tpu.dimension_semantics<arbitrary>, #tpu.dimension_semantics<arbitrary>], iteration_bounds = array<i64: 3, 1>, scalar_prefetch = 0 : i64, scratch_operands = 6 : i64, tpu.core_type = #tpu.core_type<tc>, window_params = [{transform_indices = @transform_0, window_bounds = array<i64: 128, 16>}, {pipeline_mode = #tpu.pipeline_mode<synchronous>, transform_indices = @transform_1, window_bounds = array<i64: 64, 16>}, {pipeline_mode = #tpu.pipeline_mode<synchronous>, transform_indices = @transform_2, window_bounds = array<i64: 32, 64>}, {pipeline_mode = #tpu.pipeline_mode<synchronous>, transform_indices = @transform_3, window_bounds = array<i64: 232, 1>}, {transform_indices = @transform_4, window_bounds = array<i64: 1, 128>}]} {
    %0 = tpu.iota {dimensions = array<i32: 1>} : vector<1x128xi32>
    %c128_i32 = arith.constant 128 : i32
    %1 = arith.muli %arg1, %c128_i32 : i32
    %2 = vector.broadcast %1 : i32 to vector<1x128xi32>
    %3 = arith.addi %2, %0 : vector<1x128xi32>
    %c8_i32 = arith.constant 8 : i32
    %4 = vector.broadcast %c8_i32 : i32 to vector<1x128xi32>
    %5 = arith.cmpi slt, %3, %4 : vector<1x128xi32>
    %c0 = arith.constant 0 : index
    %c0_0 = arith.constant 0 : index
    %6 = vector.load %arg3[%c0, %c0_0] : memref<64x16xf32, #tpu.memory_space<vmem>>, vector<64x16xf32>
    %c0_1 = arith.constant 0 : index
    %c0_2 = arith.constant 0 : index
    %7 = vector.load %arg2[%c0_1, %c0_2] : memref<128x16xf32, #tpu.memory_space<vmem>>, vector<128x16xf32>
    %cst = arith.constant dense<0.000000e+00> : vector<64x128xf32>
    %8 = tpu.matmul %6, %7, %cst {dimension_numbers = #tpu.dot_dimension_numbers<[1], [1], [0], [0], [0, 0, 1, 0], [], []>} : vector<64x16xf32>, vector<128x16xf32>, vector<64x128xf32> -> vector<64x128xf32>
    %c0_i32 = arith.constant 0 : i32
    %9 = arith.cmpi eq, %arg0, %c0_i32 : i32
    %10 = arith.extui %9 : i1 to i32
    %c0_i32_3 = arith.constant 0 : i32
    %11 = arith.cmpi ne, %10, %c0_i32_3 : i32
    scf.if %11 {
      %c0_i32_6 = arith.constant 0 : i32
      %18 = arith.cmpi eq, %arg1, %c0_i32_6 : i32
      %19 = arith.extui %18 : i1 to i32
      %c0_i32_7 = arith.constant 0 : i32
      %20 = arith.cmpi ne, %19, %c0_i32_7 : i32
      scf.if %20 {
        %cst_21 = arith.constant 0.000000e+00 : f32
        %39 = vector.shape_cast %5 : vector<1x128xi1> to vector<1x128xi1>
        %40 = vector.broadcast %39 : vector<1x128xi1> to vector<64x128xi1>
        %41 = vector.broadcast %cst_21 : f32 to vector<64x128xf32>
        %42 = arith.select %40, %8, %41 : vector<64x128xi1>, vector<64x128xf32>
        %cst_22 = arith.constant dense<0.000000e+00> : vector<64xf32>
        %43 = vector.multi_reduction <add>, %42, %cst_22 [1] : vector<64x128xf32> to vector<64xf32>
        %44 = vector.shape_cast %43 : vector<64xf32> to vector<64x1xf32>
        %cst_23 = arith.constant 1.250000e-01 : f32
        %45 = vector.broadcast %cst_23 : f32 to vector<64x1xf32>
        %46 = arith.mulf %44, %45 : vector<64x1xf32>
        %c0_24 = arith.constant 0 : index
        %c0_25 = arith.constant 0 : index
        %47 = vector.load %arg7[%c0_24, %c0_25] : memref<64x1xf32, #tpu.memory_space<vmem>>, vector<64x1xf32>
        tpu.vector_store %arg7[%c0_24, %c0_25], %46 {strides = array<i32>} : memref<64x1xf32, #tpu.memory_space<vmem>>, vector<64x1xf32>,
        %cst_26 = arith.constant 0.000000e+00 : f32
        %48 = vector.broadcast %cst_26 : f32 to vector<64x1xf32>
        %c0_27 = arith.constant 0 : index
        %c0_28 = arith.constant 0 : index
        %49 = vector.load %arg8[%c0_27, %c0_28] : memref<64x1xf32, #tpu.memory_space<vmem>>, vector<64x1xf32>
        tpu.vector_store %arg8[%c0_27, %c0_28], %48 {strides = array<i32>} : memref<64x1xf32, #tpu.memory_space<vmem>>, vector<64x1xf32>,
        %cst_29 = arith.constant 0.000000e+00 : f32
        %50 = vector.broadcast %cst_29 : f32 to vector<64x1xf32>
        %c0_30 = arith.constant 0 : index
        %c0_31 = arith.constant 0 : index
        %51 = vector.load %arg9[%c0_30, %c0_31] : memref<64x1xf32, #tpu.memory_space<vmem>>, vector<64x1xf32>
        tpu.vector_store %arg9[%c0_30, %c0_31], %50 {strides = array<i32>} : memref<64x1xf32, #tpu.memory_space<vmem>>, vector<64x1xf32>,
      } else {
      }
      %c0_8 = arith.constant 0 : index
      %c0_9 = arith.constant 0 : index
      %21 = vector.load %arg7[%c0_8, %c0_9] : memref<64x1xf32, #tpu.memory_space<vmem>>, vector<64x1xf32>
      %22 = vector.broadcast %21 : vector<64x1xf32> to vector<64x128xf32>
      %23 = arith.subf %8, %22 : vector<64x128xf32>
      %cst_10 = arith.constant 0.000000e+00 : f32
      %24 = vector.shape_cast %5 : vector<1x128xi1> to vector<1x128xi1>
      %25 = vector.broadcast %24 : vector<1x128xi1> to vector<64x128xi1>
      %26 = vector.broadcast %cst_10 : f32 to vector<64x128xf32>
      %27 = arith.select %25, %23, %26 : vector<64x128xi1>, vector<64x128xf32>
      %c0_11 = arith.constant 0 : index
      %c0_12 = arith.constant 0 : index
      %28 = vector.load %arg8[%c0_11, %c0_12] : memref<64x1xf32, #tpu.memory_space<vmem>>, vector<64x1xf32>
      %cst_13 = arith.constant dense<0.000000e+00> : vector<64xf32>
      %29 = vector.multi_reduction <add>, %27, %cst_13 [1] : vector<64x128xf32> to vector<64xf32>
      %30 = vector.shape_cast %29 : vector<64xf32> to vector<64x1xf32>
      %31 = arith.addf %28, %30 : vector<64x1xf32>
      %c0_14 = arith.constant 0 : index
      %c0_15 = arith.constant 0 : index
      %32 = vector.load %arg8[%c0_14, %c0_15] : memref<64x1xf32, #tpu.memory_space<vmem>>, vector<64x1xf32>
      tpu.vector_store %arg8[%c0_14, %c0_15], %31 {strides = array<i32>} : memref<64x1xf32, #tpu.memory_space<vmem>>, vector<64x1xf32>,
      %c0_16 = arith.constant 0 : index
      %c0_17 = arith.constant 0 : index
      %33 = vector.load %arg9[%c0_16, %c0_17] : memref<64x1xf32, #tpu.memory_space<vmem>>, vector<64x1xf32>
      %34 = arith.mulf %27, %27 : vector<64x128xf32>
      %cst_18 = arith.constant dense<0.000000e+00> : vector<64xf32>
      %35 = vector.multi_reduction <add>, %34, %cst_18 [1] : vector<64x128xf32> to vector<64xf32>
      %36 = vector.shape_cast %35 : vector<64xf32> to vector<64x1xf32>
      %37 = arith.addf %33, %36 : vector<64x1xf32>
      %c0_19 = arith.constant 0 : index
      %c0_20 = arith.constant 0 : index
      %38 = vector.load %arg9[%c0_19, %c0_20] : memref<64x1xf32, #tpu.memory_space<vmem>>, vector<64x1xf32>
      tpu.vector_store %arg9[%c0_19, %c0_20], %37 {strides = array<i32>} : memref<64x1xf32, #tpu.memory_space<vmem>>, vector<64x1xf32>,
    } else {
    }
    %c1_i32 = arith.constant 1 : i32
    %12 = arith.cmpi eq, %arg0, %c1_i32 : i32
    %13 = arith.extui %12 : i1 to i32
    %c0_i32_4 = arith.constant 0 : i32
    %14 = arith.cmpi ne, %13, %c0_i32_4 : i32
    scf.if %14 {
      %c0_i32_6 = arith.constant 0 : i32
      %18 = arith.cmpi eq, %arg1, %c0_i32_6 : i32
      %19 = arith.extui %18 : i1 to i32
      %c0_i32_7 = arith.constant 0 : i32
      %20 = arith.cmpi ne, %19, %c0_i32_7 : i32
      scf.if %20 {
        %c0_31 = arith.constant 0 : index
        %c0_32 = arith.constant 0 : index
        %52 = vector.load %arg5[%c0_31, %c0_32] : memref<232x1xf32, #tpu.memory_space<vmem>>, vector<64x1xf32>
        %c64 = arith.constant 64 : index
        %c0_33 = arith.constant 0 : index
        %53 = vector.load %arg5[%c64, %c0_33] : memref<232x1xf32, #tpu.memory_space<vmem>>, vector<64x1xf32>
        %c0_34 = arith.constant 0 : index
        %c0_35 = arith.constant 0 : index
        %54 = vector.load %arg8[%c0_34, %c0_35] : memref<64x1xf32, #tpu.memory_space<vmem>>, vector<64x1xf32>
        %cst_36 = arith.constant 1.250000e-01 : f32
        %55 = vector.broadcast %cst_36 : f32 to vector<64x1xf32>
        %56 = arith.mulf %54, %55 : vector<64x1xf32>
        %c0_37 = arith.constant 0 : index
        %c0_38 = arith.constant 0 : index
        %57 = vector.load %arg9[%c0_37, %c0_38] : memref<64x1xf32, #tpu.memory_space<vmem>>, vector<64x1xf32>
        %cst_39 = arith.constant 1.250000e-01 : f32
        %58 = vector.broadcast %cst_39 : f32 to vector<64x1xf32>
        %59 = arith.mulf %57, %58 : vector<64x1xf32>
        %60 = arith.mulf %56, %56 : vector<64x1xf32>
        %61 = arith.subf %59, %60 : vector<64x1xf32>
        %cst_40 = arith.constant 0.000000e+00 : f32
        %62 = vector.broadcast %cst_40 : f32 to vector<64x1xf32>
        %63 = arith.maximumf %61, %62 : vector<64x1xf32>
        %c0_41 = arith.constant 0 : index
        %c0_42 = arith.constant 0 : index
        %64 = vector.load %arg7[%c0_41, %c0_42] : memref<64x1xf32, #tpu.memory_space<vmem>>, vector<64x1xf32>
        %65 = arith.addf %64, %56 : vector<64x1xf32>
        %cst_43 = arith.constant 9.99999974E-6 : f32
        %66 = vector.broadcast %cst_43 : f32 to vector<64x1xf32>
        %67 = arith.addf %63, %66 : vector<64x1xf32>
        %68 = math.rsqrt %67 : vector<64x1xf32>
        %69 = arith.mulf %52, %68 : vector<64x1xf32>
        %c0_44 = arith.constant 0 : index
        %c0_45 = arith.constant 0 : index
        %70 = vector.load %arg8[%c0_44, %c0_45] : memref<64x1xf32, #tpu.memory_space<vmem>>, vector<64x1xf32>
        tpu.vector_store %arg8[%c0_44, %c0_45], %69 {strides = array<i32>} : memref<64x1xf32, #tpu.memory_space<vmem>>, vector<64x1xf32>,
        %71 = arith.mulf %65, %69 : vector<64x1xf32>
        %72 = arith.subf %53, %71 : vector<64x1xf32>
        %c0_46 = arith.constant 0 : index
        %c0_47 = arith.constant 0 : index
        %73 = vector.load %arg9[%c0_46, %c0_47] : memref<64x1xf32, #tpu.memory_space<vmem>>, vector<64x1xf32>
        tpu.vector_store %arg9[%c0_46, %c0_47], %72 {strides = array<i32>} : memref<64x1xf32, #tpu.memory_space<vmem>>, vector<64x1xf32>,
      } else {
      }
      %c0_8 = arith.constant 0 : index
      %c0_9 = arith.constant 0 : index
      %21 = vector.load %arg8[%c0_8, %c0_9] : memref<64x1xf32, #tpu.memory_space<vmem>>, vector<64x1xf32>
      %22 = vector.broadcast %21 : vector<64x1xf32> to vector<64x128xf32>
      %23 = arith.mulf %8, %22 : vector<64x128xf32>
      %c0_10 = arith.constant 0 : index
      %c0_11 = arith.constant 0 : index
      %24 = vector.load %arg9[%c0_10, %c0_11] : memref<64x1xf32, #tpu.memory_space<vmem>>, vector<64x1xf32>
      %25 = vector.broadcast %24 : vector<64x1xf32> to vector<64x128xf32>
      %26 = arith.addf %23, %25 : vector<64x128xf32>
      %cst_12 = arith.constant 0.000000e+00 : f32
      %27 = vector.broadcast %cst_12 : f32 to vector<64x128xf32>
      %28 = arith.maximumf %26, %27 : vector<64x128xf32>
      %c0_13 = arith.constant 0 : index
      %c0_14 = arith.constant 0 : index
      %29 = vector.load %arg4[%c0_13, %c0_14] : memref<32x64xf32, #tpu.memory_space<vmem>>, vector<32x64xf32>
      %cst_15 = arith.constant dense<0.000000e+00> : vector<32x128xf32>
      %30 = tpu.matmul %29, %28, %cst_15 {dimension_numbers = #tpu.dot_dimension_numbers<[1], [0], [0], [1], [0, 0, 1, 1], [], []>} : vector<32x64xf32>, vector<64x128xf32>, vector<32x128xf32> -> vector<32x128xf32>
      %c0_i32_16 = arith.constant 0 : i32
      %31 = arith.cmpi eq, %arg1, %c0_i32_16 : i32
      %32 = arith.extui %31 : i1 to i32
      %c0_i32_17 = arith.constant 0 : i32
      %33 = arith.cmpi ne, %32, %c0_i32_17 : i32
      scf.if %33 {
        %cst_31 = arith.constant 0.000000e+00 : f32
        %52 = vector.shape_cast %5 : vector<1x128xi1> to vector<1x128xi1>
        %53 = vector.broadcast %52 : vector<1x128xi1> to vector<32x128xi1>
        %54 = vector.broadcast %cst_31 : f32 to vector<32x128xf32>
        %55 = arith.select %53, %30, %54 : vector<32x128xi1>, vector<32x128xf32>
        %cst_32 = arith.constant dense<0.000000e+00> : vector<32xf32>
        %56 = vector.multi_reduction <add>, %55, %cst_32 [1] : vector<32x128xf32> to vector<32xf32>
        %57 = vector.shape_cast %56 : vector<32xf32> to vector<32x1xf32>
        %cst_33 = arith.constant 1.250000e-01 : f32
        %58 = vector.broadcast %cst_33 : f32 to vector<32x1xf32>
        %59 = arith.mulf %57, %58 : vector<32x1xf32>
        %c0_34 = arith.constant 0 : index
        %c0_35 = arith.constant 0 : index
        %60 = vector.load %arg10[%c0_34, %c0_35] : memref<32x1xf32, #tpu.memory_space<vmem>>, vector<32x1xf32>
        tpu.vector_store %arg10[%c0_34, %c0_35], %59 {strides = array<i32>} : memref<32x1xf32, #tpu.memory_space<vmem>>, vector<32x1xf32>,
        %cst_36 = arith.constant 0.000000e+00 : f32
        %61 = vector.broadcast %cst_36 : f32 to vector<32x1xf32>
        %c0_37 = arith.constant 0 : index
        %c0_38 = arith.constant 0 : index
        %62 = vector.load %arg11[%c0_37, %c0_38] : memref<32x1xf32, #tpu.memory_space<vmem>>, vector<32x1xf32>
        tpu.vector_store %arg11[%c0_37, %c0_38], %61 {strides = array<i32>} : memref<32x1xf32, #tpu.memory_space<vmem>>, vector<32x1xf32>,
        %cst_39 = arith.constant 0.000000e+00 : f32
        %63 = vector.broadcast %cst_39 : f32 to vector<32x1xf32>
        %c0_40 = arith.constant 0 : index
        %c0_41 = arith.constant 0 : index
        %64 = vector.load %arg12[%c0_40, %c0_41] : memref<32x1xf32, #tpu.memory_space<vmem>>, vector<32x1xf32>
        tpu.vector_store %arg12[%c0_40, %c0_41], %63 {strides = array<i32>} : memref<32x1xf32, #tpu.memory_space<vmem>>, vector<32x1xf32>,
      } else {
      }
      %c0_18 = arith.constant 0 : index
      %c0_19 = arith.constant 0 : index
      %34 = vector.load %arg10[%c0_18, %c0_19] : memref<32x1xf32, #tpu.memory_space<vmem>>, vector<32x1xf32>
      %35 = vector.broadcast %34 : vector<32x1xf32> to vector<32x128xf32>
      %36 = arith.subf %30, %35 : vector<32x128xf32>
      %cst_20 = arith.constant 0.000000e+00 : f32
      %37 = vector.shape_cast %5 : vector<1x128xi1> to vector<1x128xi1>
      %38 = vector.broadcast %37 : vector<1x128xi1> to vector<32x128xi1>
      %39 = vector.broadcast %cst_20 : f32 to vector<32x128xf32>
      %40 = arith.select %38, %36, %39 : vector<32x128xi1>, vector<32x128xf32>
      %c0_21 = arith.constant 0 : index
      %c0_22 = arith.constant 0 : index
      %41 = vector.load %arg11[%c0_21, %c0_22] : memref<32x1xf32, #tpu.memory_space<vmem>>, vector<32x1xf32>
      %cst_23 = arith.constant dense<0.000000e+00> : vector<32xf32>
      %42 = vector.multi_reduction <add>, %40, %cst_23 [1] : vector<32x128xf32> to vector<32xf32>
      %43 = vector.shape_cast %42 : vector<32xf32> to vector<32x1xf32>
      %44 = arith.addf %41, %43 : vector<32x1xf32>
      %c0_24 = arith.constant 0 : index
      %c0_25 = arith.constant 0 : index
      %45 = vector.load %arg11[%c0_24, %c0_25] : memref<32x1xf32, #tpu.memory_space<vmem>>, vector<32x1xf32>
      tpu.vector_store %arg11[%c0_24, %c0_25], %44 {strides = array<i32>} : memref<32x1xf32, #tpu.memory_space<vmem>>, vector<32x1xf32>,
      %c0_26 = arith.constant 0 : index
      %c0_27 = arith.constant 0 : index
      %46 = vector.load %arg12[%c0_26, %c0_27] : memref<32x1xf32, #tpu.memory_space<vmem>>, vector<32x1xf32>
      %47 = arith.mulf %40, %40 : vector<32x128xf32>
      %cst_28 = arith.constant dense<0.000000e+00> : vector<32xf32>
      %48 = vector.multi_reduction <add>, %47, %cst_28 [1] : vector<32x128xf32> to vector<32xf32>
      %49 = vector.shape_cast %48 : vector<32xf32> to vector<32x1xf32>
      %50 = arith.addf %46, %49 : vector<32x1xf32>
      %c0_29 = arith.constant 0 : index
      %c0_30 = arith.constant 0 : index
      %51 = vector.load %arg12[%c0_29, %c0_30] : memref<32x1xf32, #tpu.memory_space<vmem>>, vector<32x1xf32>
      tpu.vector_store %arg12[%c0_29, %c0_30], %50 {strides = array<i32>} : memref<32x1xf32, #tpu.memory_space<vmem>>, vector<32x1xf32>,
    } else {
    }
    %c2_i32 = arith.constant 2 : i32
    %15 = arith.cmpi eq, %arg0, %c2_i32 : i32
    %16 = arith.extui %15 : i1 to i32
    %c0_i32_5 = arith.constant 0 : i32
    %17 = arith.cmpi ne, %16, %c0_i32_5 : i32
    scf.if %17 {
      %c0_i32_6 = arith.constant 0 : i32
      %18 = arith.cmpi eq, %arg1, %c0_i32_6 : i32
      %19 = arith.extui %18 : i1 to i32
      %c0_i32_7 = arith.constant 0 : i32
      %20 = arith.cmpi ne, %19, %c0_i32_7 : i32
      scf.if %20 {
        %c128 = arith.constant 128 : index
        %c0_27 = arith.constant 0 : index
        %53 = vector.load %arg5[%c128, %c0_27] : memref<232x1xf32, #tpu.memory_space<vmem>>, vector<32x1xf32>
        %c160 = arith.constant 160 : index
        %c0_28 = arith.constant 0 : index
        %54 = vector.load %arg5[%c160, %c0_28] : memref<232x1xf32, #tpu.memory_space<vmem>>, vector<32x1xf32>
        %c0_29 = arith.constant 0 : index
        %c0_30 = arith.constant 0 : index
        %55 = vector.load %arg11[%c0_29, %c0_30] : memref<32x1xf32, #tpu.memory_space<vmem>>, vector<32x1xf32>
        %cst_31 = arith.constant 1.250000e-01 : f32
        %56 = vector.broadcast %cst_31 : f32 to vector<32x1xf32>
        %57 = arith.mulf %55, %56 : vector<32x1xf32>
        %c0_32 = arith.constant 0 : index
        %c0_33 = arith.constant 0 : index
        %58 = vector.load %arg12[%c0_32, %c0_33] : memref<32x1xf32, #tpu.memory_space<vmem>>, vector<32x1xf32>
        %cst_34 = arith.constant 1.250000e-01 : f32
        %59 = vector.broadcast %cst_34 : f32 to vector<32x1xf32>
        %60 = arith.mulf %58, %59 : vector<32x1xf32>
        %61 = arith.mulf %57, %57 : vector<32x1xf32>
        %62 = arith.subf %60, %61 : vector<32x1xf32>
        %cst_35 = arith.constant 0.000000e+00 : f32
        %63 = vector.broadcast %cst_35 : f32 to vector<32x1xf32>
        %64 = arith.maximumf %62, %63 : vector<32x1xf32>
        %c0_36 = arith.constant 0 : index
        %c0_37 = arith.constant 0 : index
        %65 = vector.load %arg10[%c0_36, %c0_37] : memref<32x1xf32, #tpu.memory_space<vmem>>, vector<32x1xf32>
        %66 = arith.addf %65, %57 : vector<32x1xf32>
        %cst_38 = arith.constant 9.99999974E-6 : f32
        %67 = vector.broadcast %cst_38 : f32 to vector<32x1xf32>
        %68 = arith.addf %64, %67 : vector<32x1xf32>
        %69 = math.rsqrt %68 : vector<32x1xf32>
        %70 = arith.mulf %53, %69 : vector<32x1xf32>
        %c0_39 = arith.constant 0 : index
        %c0_40 = arith.constant 0 : index
        %71 = vector.load %arg11[%c0_39, %c0_40] : memref<32x1xf32, #tpu.memory_space<vmem>>, vector<32x1xf32>
        tpu.vector_store %arg11[%c0_39, %c0_40], %70 {strides = array<i32>} : memref<32x1xf32, #tpu.memory_space<vmem>>, vector<32x1xf32>,
        %72 = arith.mulf %66, %70 : vector<32x1xf32>
        %73 = arith.subf %54, %72 : vector<32x1xf32>
        %c0_41 = arith.constant 0 : index
        %c0_42 = arith.constant 0 : index
        %74 = vector.load %arg12[%c0_41, %c0_42] : memref<32x1xf32, #tpu.memory_space<vmem>>, vector<32x1xf32>
        tpu.vector_store %arg12[%c0_41, %c0_42], %73 {strides = array<i32>} : memref<32x1xf32, #tpu.memory_space<vmem>>, vector<32x1xf32>,
      } else {
      }
      %c0_8 = arith.constant 0 : index
      %c0_9 = arith.constant 0 : index
      %21 = vector.load %arg8[%c0_8, %c0_9] : memref<64x1xf32, #tpu.memory_space<vmem>>, vector<64x1xf32>
      %22 = vector.broadcast %21 : vector<64x1xf32> to vector<64x128xf32>
      %23 = arith.mulf %8, %22 : vector<64x128xf32>
      %c0_10 = arith.constant 0 : index
      %c0_11 = arith.constant 0 : index
      %24 = vector.load %arg9[%c0_10, %c0_11] : memref<64x1xf32, #tpu.memory_space<vmem>>, vector<64x1xf32>
      %25 = vector.broadcast %24 : vector<64x1xf32> to vector<64x128xf32>
      %26 = arith.addf %23, %25 : vector<64x128xf32>
      %cst_12 = arith.constant 0.000000e+00 : f32
      %27 = vector.broadcast %cst_12 : f32 to vector<64x128xf32>
      %28 = arith.maximumf %26, %27 : vector<64x128xf32>
      %c0_13 = arith.constant 0 : index
      %c0_14 = arith.constant 0 : index
      %29 = vector.load %arg4[%c0_13, %c0_14] : memref<32x64xf32, #tpu.memory_space<vmem>>, vector<32x64xf32>
      %cst_15 = arith.constant dense<0.000000e+00> : vector<32x128xf32>
      %30 = tpu.matmul %29, %28, %cst_15 {dimension_numbers = #tpu.dot_dimension_numbers<[1], [0], [0], [1], [0, 0, 1, 1], [], []>} : vector<32x64xf32>, vector<64x128xf32>, vector<32x128xf32> -> vector<32x128xf32>
      %c0_16 = arith.constant 0 : index
      %c0_17 = arith.constant 0 : index
      %31 = vector.load %arg11[%c0_16, %c0_17] : memref<32x1xf32, #tpu.memory_space<vmem>>, vector<32x1xf32>
      %32 = vector.broadcast %31 : vector<32x1xf32> to vector<32x128xf32>
      %33 = arith.mulf %30, %32 : vector<32x128xf32>
      %c0_18 = arith.constant 0 : index
      %c0_19 = arith.constant 0 : index
      %34 = vector.load %arg12[%c0_18, %c0_19] : memref<32x1xf32, #tpu.memory_space<vmem>>, vector<32x1xf32>
      %35 = vector.broadcast %34 : vector<32x1xf32> to vector<32x128xf32>
      %36 = arith.addf %33, %35 : vector<32x128xf32>
      %cst_20 = arith.constant 0.000000e+00 : f32
      %37 = vector.broadcast %cst_20 : f32 to vector<32x128xf32>
      %38 = arith.maximumf %36, %37 : vector<32x128xf32>
      %c192 = arith.constant 192 : index
      %c0_21 = arith.constant 0 : index
      %39 = vector.load %arg5[%c192, %c0_21] : memref<232x1xf32, #tpu.memory_space<vmem>>, vector<32x1xf32>
      %c224 = arith.constant 224 : index
      %c0_22 = arith.constant 0 : index
      %40 = vector.load %arg5[%c224, %c0_22] : memref<232x1xf32, #tpu.memory_space<vmem>>, vector<1x1xf32>
      %41 = vector.broadcast %39 : vector<32x1xf32> to vector<32x128xf32>
      %42 = arith.mulf %38, %41 : vector<32x128xf32>
      %cst_23 = arith.constant dense<0.000000e+00> : vector<128xf32>
      %43 = vector.multi_reduction <add>, %42, %cst_23 [0] : vector<32x128xf32> to vector<128xf32>
      %44 = vector.shape_cast %43 : vector<128xf32> to vector<1x128xf32>
      %45 = vector.broadcast %40 : vector<1x1xf32> to vector<1x128xf32>
      %46 = arith.addf %44, %45 : vector<1x128xf32>
      %47 = arith.negf %46 : vector<1x128xf32>
      %48 = math.exp %47 : vector<1x128xf32>
      %cst_24 = arith.constant 1.000000e+00 : f32
      %49 = vector.broadcast %cst_24 : f32 to vector<1x128xf32>
      %50 = arith.addf %49, %48 : vector<1x128xf32>
      %51 = arith.divf %49, %50 : vector<1x128xf32>
      %c0_25 = arith.constant 0 : index
      %c0_26 = arith.constant 0 : index
      %52 = vector.load %arg6[%c0_25, %c0_26] : memref<1x128xf32, #tpu.memory_space<vmem>>, vector<1x128xf32>
      tpu.vector_store %arg6[%c0_25, %c0_26], %51 {strides = array<i32>} : memref<1x128xf32, #tpu.memory_space<vmem>>, vector<1x128xf32>,
    } else {
    }
    return
  }
  func.func @transform_0(%arg0: i32, %arg1: i32) -> (i32, i32) {
    %c0_i32 = arith.constant 0 : i32
    %c0_i32_0 = arith.constant 0 : i32
    return %arg1, %c0_i32 : i32, i32
  }
  func.func @transform_1(%arg0: i32, %arg1: i32) -> (i32, i32) {
    %c0_i32 = arith.constant 0 : i32
    %c0_i32_0 = arith.constant 0 : i32
    %c0_i32_1 = arith.constant 0 : i32
    return %c0_i32, %c0_i32_0 : i32, i32
  }
  func.func @transform_2(%arg0: i32, %arg1: i32) -> (i32, i32) {
    %c0_i32 = arith.constant 0 : i32
    %c0_i32_0 = arith.constant 0 : i32
    %c0_i32_1 = arith.constant 0 : i32
    return %c0_i32, %c0_i32_0 : i32, i32
  }
  func.func @transform_3(%arg0: i32, %arg1: i32) -> (i32, i32) {
    %c0_i32 = arith.constant 0 : i32
    %c0_i32_0 = arith.constant 0 : i32
    %c0_i32_1 = arith.constant 0 : i32
    return %c0_i32, %c0_i32_0 : i32, i32
  }
  func.func @transform_4(%arg0: i32, %arg1: i32) -> (i32, i32) {
    %c0_i32 = arith.constant 0 : i32
    %c0_i32_0 = arith.constant 0 : i32
    return %c0_i32, %arg1 : i32, i32
  }
}

</mosaic_0001>

<bundles_post_ra>
// kernel: neuralnet_forward.1
= control target key start
LH: loop header
LB: loop body
LE: loop exit
PB: predicated region body
PF: predicated region fallthrough
CT: control target
= control target key end

     0   :  { %9 = vsyncpa [#allocation9], 0  ;;  %s2054_s15 = smov 0   ;;  %s2056_s16 = smov 0   ;;  %s2607_s0 = inlined_call_operand.vmem [shape: f32[8,16], index: 0, kind: input, shape index: {}]   ;;  %s2608_s1 = inlined_call_operand.vmem [shape: f32[64,16], index: 1, kind: input, shape index: {}]   ;;  %s2609_s2 = inlined_call_operand.vmem [shape: f32[32,64], index: 2, kind: input, shape index: {}]   ;;  %s2610_s3 = inlined_call_operand.vmem [shape: f32[232,1], index: 3, kind: input, shape index: {}]   ;;  %s2611_s4 = inlined_call_operand.hbm [shape: f32[1,8], index: 4, kind: output, shape index: {}]  }
   0x1   :  { %s2058_s17 = smov 0  }
   0x2 LB: > { %s1607_s18 = sadd.s32 4294967295, %s2021_s17   ;;  %s27_s19 = sadd.s32 1, %s2017_s16  ;;  %s2021_s17 = sphi %s2058_s17, %s15_s17   ;;  %s2017_s16 = sphi %s2056_s16, %s2616_s16   ;;  %s2013_s15 = sphi %s2054_s15, %s2615_s15  }
   0x3   : > { %p29_p0 = scmp.ge.s32.totalorder %s27_s19, 3  ;;  %p1610_p1 = scmp.ge.s32.totalorder %s2021_s17, 1 }
   0x4   : > { %p180_p2 = scmp.lt.s32.totalorder %s2021_s17, 4 }
   0x5   : > { %s2618_s19 = smov (%p29_p0, %s27_s19), 0 }
   0x6   : > { %p181_p3 = pnand %p1610_p1, %p180_p2 }
   0x7   : > { %v213_v0 = vlaneseq (!%p181_p3)  ;;  %v227_v1 = vld [vmem:[%s2607_s0] sm:$0xff] (!%p181_p3)  ;;  %v228_v2 = vld [vmem:[%s2607_s0 + $0x8] sm:$0xff] (!%p181_p3)  ;;  %vm243_vm0 = vcmask (!%p181_p3), 130048   ;;  %v229_v3 = vld [vmem:[%s2607_s0 + $0x10] sm:$0xff] (!%p181_p3)  ;;  %p1635_p4 = scmp.ne.s32.totalorder (!%p181_p3), %s2013_s15, 0 }
   0x8   : > { %184 = sbr.rel (%p181_p3) target bundleno = 2088 (0x828), region = 36  ;;  %v1787_v4 = vpack.c.bf16 (!%p181_p3), %v228_v2, %v227_v1  ;;  %vm2086_vm1 = vmpackc.low (!%p181_p3), %vm243_vm0, %vm243_vm0  ;;  %v230_v6 = vld [vmem:[%s2607_s0 + $0x18] sm:$0xff] (!%p181_p3)  ;;  %v219_v9 = vld [vmem:[%s2608_s1] sm:$0xff] (!%p181_p3) }
   0x9   : > { %v2093_v7 = vand.u32 (!%p181_p3), 127, %v213_v0  ;;  %v1793_v8 = vpack.c.bf16 (!%p181_p3), %v230_v6, %v229_v3  ;;  %v231_v10 = vld [vmem:[%s2607_s0 + $0x20] sm:$0xff] (!%p181_p3)  ;;  %v232_v11 = vld [vmem:[%s2607_s0 + $0x28] sm:$0xff] (!%p181_p3)  ;;  %1731 = vmatprep.mubr.msk.f32.mxu0 (!%p181_p3), %vm243_vm0, %v219_v9  ;;  %v233_v14 = vld [vmem:[%s2607_s0 + $0x30] sm:$0xff] (!%p181_p3) }
   0xa   : > { %1789 = vmatprep.subr.msk.bf16.mxu0 (!%p181_p3), %vm2086_vm1, %v1787_v4  ;;  %1867 = vmatprep.subr.msk.bf16.mxu1 (!%p181_p3), %vm2086_vm1, %v1787_v4  ;;  %v223_v12 = vld [vmem:[%s2608_s1 + $0x20] sm:$0xff] (!%p181_p3)  ;;  %v1799_v13 = vpack.c.bf16 (!%p181_p3), %v232_v11, %v231_v10  ;;  %v234_v15 = vld [vmem:[%s2607_s0 + $0x38] sm:$0xff] (!%p181_p3)  ;;  %v236_v18 = vld [vmem:[%s2607_s0 + $0x48] sm:$0xff] (!%p181_p3) }
   0xb   : > { %vm218_vm2 = vcmp.lt.s32.totalorder (!%p181_p3), %v2093_v7, 8  ;;  %1792 = vmatpush3.bf16.xpose.msk.msra.mxu0 (!%p181_p3), %vm2086_vm1, %v1787_v4  ;;  %1875 = vmatpush3.bf16.xpose.msk.msra.mxu1 (!%p181_p3), %vm2086_vm1, %v1787_v4  ;;  %v1805_v16 = vpack.c.bf16 (!%p181_p3), %v234_v15, %v233_v14  ;;  %v235_v17 = vld [vmem:[%s2607_s0 + $0x40] sm:$0xff] (!%p181_p3)  ;;  %v237_v20 = vld [vmem:[%s2607_s0 + $0x50] sm:$0xff] (!%p181_p3)  ;;  %v238_v21 = vld [vmem:[%s2607_s0 + $0x58] sm:$0xff] (!%p181_p3) }
   0xc   : > { %1795 = vmatprep.subr.msk.bf16.mxu0 (!%p181_p3), %vm2086_vm1, %v1793_v8  ;;  %1868 = vmatprep.subr.msk.bf16.mxu1 (!%p181_p3), %vm2086_vm1, %v1793_v8  ;;  %v1811_v19 = vpack.c.bf16 (!%p181_p3), %v236_v18, %v235_v17  ;;  %v1817_v22 = vpack.c.bf16 (!%p181_p3), %v238_v21, %v237_v20  ;;  %v239_v23 = vld [vmem:[%s2607_s0 + $0x60] sm:$0xff] (!%p181_p3)  ;;  %v240_v24 = vld [vmem:[%s2607_s0 + $0x68] sm:$0xff] (!%p181_p3)  ;;  %v241_v26 = vld [vmem:[%s2607_s0 + $0x70] sm:$0xff] (!%p181_p3) }
   0xd   : > { %1737 = vmatprep.mubr.msk.f32.mxu1 (!%p181_p3), %vm243_vm0, %v223_v12  ;;  %v1823_v25 = vpack.c.bf16 (!%p181_p3), %v240_v24, %v239_v23  ;;  %v242_v27 = vld [vmem:[%s2607_s0 + $0x78] sm:$0xff] (!%p181_p3)  ;;  %v220_v29 = vld [vmem:[%s2608_s1 + $0x8] sm:$0xff] (!%p181_p3)  ;;  %v221_v31 = vld [vmem:[%s2608_s1 + $0x10] sm:$0xff] (!%p181_p3) }
   0xe   : > { %v1829_v28 = vpack.c.bf16 (!%p181_p3), %v242_v27, %v241_v26  ;;  %v224_v30 = vld [vmem:[%s2608_s1 + $0x28] sm:$0xff] (!%p181_p3)  ;;  %v225_v32 = vld [vmem:[%s2608_s1 + $0x30] sm:$0xff] (!%p181_p3)  ;;  %v222_v33 = vld [vmem:[%s2608_s1 + $0x18] sm:$0xff] (!%p181_p3) }
   0xf   : > { %v226_v34 = vld [vmem:[%s2608_s1 + $0x38] sm:$0xff]  ;;  %v2023_v51 = vmov (!%p1635_p4), 0   ;;  %vm463_vm3 = vcmask (!%p1635_p4), 7168  }
  0x10   : > { %1935 = vset.pattern.permute.xlu0 (!%p1635_p4), %v2023_v51  ;;  %1936 = vset.pattern.permute.xlu1 (!%p1635_p4), %v2023_v51 }
  0x13   : > { %1798 = vmatpush3.bf16.xpose.msk.msra.mxu0 %vm2086_vm1, %v1793_v8  ;;  %1876 = vmatpush3.bf16.xpose.msk.msra.mxu1 %vm2086_vm1, %v1793_v8 }
  0x14   : > { %1801 = vmatprep.subr.msk.bf16.mxu0 %vm2086_vm1, %v1799_v13  ;;  %1869 = vmatprep.subr.msk.bf16.mxu1 %vm2086_vm1, %v1799_v13 }
  0x1b   : > { %1804 = vmatpush3.bf16.xpose.msk.msra.mxu0 %vm2086_vm1, %v1799_v13  ;;  %1877 = vmatpush3.bf16.xpose.msk.msra.mxu1 %vm2086_vm1, %v1799_v13  ;;  %v2024_v13 = vmov (!%p1635_p4), 0.0  }
  0x1c   : > { %1807 = vmatprep.subr.msk.bf16.mxu0 %vm2086_vm1, %v1805_v16  ;;  %1870 = vmatprep.subr.msk.bf16.mxu1 %vm2086_vm1, %v1805_v16  ;;  %472 = vst.msk [vmem:[#allocation3] sm:$0xff] (!%p1635_p4), %vm463_vm3, %v2024_v13  ;;  %473 = vst.msk [vmem:[#allocation3 + $0x8] sm:$0xff] (!%p1635_p4), %vm463_vm3, %v2024_v13 }
  0x1d   : > { %474 = vst.msk [vmem:[#allocation3 + $0x10] sm:$0xff] (!%p1635_p4), %vm463_vm3, %v2024_v13  ;;  %475 = vst.msk [vmem:[#allocation3 + $0x18] sm:$0xff] (!%p1635_p4), %vm463_vm3, %v2024_v13 }
  0x1e   : > { %476 = vst.msk [vmem:[#allocation3 + $0x20] sm:$0xff] (!%p1635_p4), %vm463_vm3, %v2024_v13  ;;  %477 = vst.msk [vmem:[#allocation3 + $0x28] sm:$0xff] (!%p1635_p4), %vm463_vm3, %v2024_v13 }
  0x1f   : > { %478 = vst.msk [vmem:[#allocation3 + $0x30] sm:$0xff] (!%p1635_p4), %vm463_vm3, %v2024_v13  ;;  %479 = vst.msk [vmem:[#allocation3 + $0x38] sm:$0xff] (!%p1635_p4), %vm463_vm3, %v2024_v13 }
  0x20   : > { %480 = vst.msk [vmem:[#allocation4] sm:$0xff] (!%p1635_p4), %vm463_vm3, %v2024_v13  ;;  %481 = vst.msk [vmem:[#allocation4 + $0x8] sm:$0xff] (!%p1635_p4), %vm463_vm3, %v2024_v13 }
  0x21   : > { %482 = vst.msk [vmem:[#allocation4 + $0x10] sm:$0xff] (!%p1635_p4), %vm463_vm3, %v2024_v13  ;;  %483 = vst.msk [vmem:[#allocation4 + $0x18] sm:$0xff] (!%p1635_p4), %vm463_vm3, %v2024_v13 }
  0x22   : > { %484 = vst.msk [vmem:[#allocation4 + $0x20] sm:$0xff] (!%p1635_p4), %vm463_vm3, %v2024_v13  ;;  %485 = vst.msk [vmem:[#allocation4 + $0x28] sm:$0xff] (!%p1635_p4), %vm463_vm3, %v2024_v13 }
  0x23   : > { %1810 = vmatpush3.bf16.xpose.msk.msra.mxu0 %vm2086_vm1, %v1805_v16  ;;  %1878 = vmatpush3.bf16.xpose.msk.msra.mxu1 %vm2086_vm1, %v1805_v16  ;;  %486 = vst.msk [vmem:[#allocation4 + $0x30] sm:$0xff] (!%p1635_p4), %vm463_vm3, %v2024_v13  ;;  %487 = vst.msk [vmem:[#allocation4 + $0x38] sm:$0xff] (!%p1635_p4), %vm463_vm3, %v2024_v13 }
  0x24   : > { %1813 = vmatprep.subr.msk.bf16.mxu0 %vm2086_vm1, %v1811_v19  ;;  %1871 = vmatprep.subr.msk.bf16.mxu1 %vm2086_vm1, %v1811_v19 }
  0x27   : > { %v595_v13 = vld [vmem:[#allocation4] sm:$0xff] (!%p1635_p4) }
  0x2b   : > { %1816 = vmatpush3.bf16.xpose.msk.msra.mxu0 %vm2086_vm1, %v1811_v19  ;;  %1879 = vmatpush3.bf16.xpose.msk.msra.mxu1 %vm2086_vm1, %v1811_v19 }
  0x2c   : > { %1819 = vmatprep.subr.msk.bf16.mxu0 %vm2086_vm1, %v1817_v22  ;;  %1872 = vmatprep.subr.msk.bf16.mxu1 %vm2086_vm1, %v1817_v22 }
  0x33   : > { %1822 = vmatpush3.bf16.xpose.msk.msra.mxu0 %vm2086_vm1, %v1817_v22  ;;  %1880 = vmatpush3.bf16.xpose.msk.msra.mxu1 %vm2086_vm1, %v1817_v22 }
  0x34   : > { %1825 = vmatprep.subr.msk.bf16.mxu0 %vm2086_vm1, %v1823_v25  ;;  %1873 = vmatprep.subr.msk.bf16.mxu1 %vm2086_vm1, %v1823_v25 }
  0x3b   : > { %1828 = vmatpush3.bf16.xpose.msk.msra.mxu0 %vm2086_vm1, %v1823_v25  ;;  %1881 = vmatpush3.bf16.xpose.msk.msra.mxu1 %vm2086_vm1, %v1823_v25 }
  0x3c   : > { %1831 = vmatprep.subr.msk.bf16.mxu0 %vm2086_vm1, %v1829_v28  ;;  %1874 = vmatprep.subr.msk.bf16.mxu1 %vm2086_vm1, %v1829_v28 }
  0x43   : > { %1834 = vmatpush3.bf16.xpose.msk.msra.mxu0 %vm2086_vm1, %v1829_v28  ;;  %1882 = vmatpush3.bf16.xpose.msk.msra.mxu1 %vm2086_vm1, %v1829_v28 }
  0x4a   : > { %1732 = vmatmul.mubr.msk.f32.vlgmr.msra.gmra.mrb[0].mxu0 %vm243_vm0, %v220_v29  ;;  %1738 = vmatmul.mubr.msk.f32.vlgmr.msra.gmra.mrb[0].mxu1 %vm243_vm0, %v224_v30 }
  0x4b   : > { %1734 = vmatprep.mubr.msk.f32.mxu0 %vm243_vm0, %v221_v31  ;;  %1740 = vmatprep.mubr.msk.f32.mxu1 %vm243_vm0, %v225_v32 }
  0x4e   : > { %1735 = vmatmul.mubr.msk.f32.gmra.mrb[2].mxu0 %vm243_vm0, %v222_v33  ;;  %1741 = vmatmul.mubr.msk.f32.gmra.mrb[2].mxu1 %vm243_vm0, %v226_v34 }
 0x11c   : > { %424 = sbr.rel (%p1635_p4) target bundleno = 760 (0x2f8), region = 40 }
 0x11d   : > { %v2228_v35 = vpop.f32.mrb[0].mxu0  ;;  %v2230_v36 = vpop.f32.mrb[0].mxu1 }
 0x11e   : > { %v2232_v37 = vpop.f32.mrb[1].mxu0  ;;  %v2234_v38 = vpop.f32.mrb[1].mxu1  ;;  %v432_v45 = vsel (!%p1635_p4), %vm218_vm2, %v2228_v35, 0.0  ;;  %v436_v48 = vsel (!%p1635_p4), %vm218_vm2, %v2230_v36, 0.0 }
 0x11f   : > { %v431_v43 = vsel (!%p1635_p4), %vm218_vm2, %v2232_v37, 0.0  ;;  %v435_v47 = vsel (!%p1635_p4), %vm218_vm2, %v2234_v38, 0.0 }
 0x120   : > { %439 = vadd.xlane.f32.xlu0 (!%p1635_p4), %v431_v43 }
 0x121   : > { %v2236_v39 = vpop.f32.mrb[2].mxu0  ;;  %v2238_v40 = vpop.f32.mrb[2].mxu1 }
 0x122   : > { %v2240_v41 = vpop.f32.mrb[3].mxu0  ;;  %v2242_v42 = vpop.f32.mrb[3].mxu1  ;;  %v434_v46 = vsel (!%p1635_p4), %vm218_vm2, %v2236_v39, 0.0  ;;  %v438_v50 = vsel (!%p1635_p4), %vm218_vm2, %v2238_v40, 0.0 }
 0x123   : > { %v433_v44 = vsel %vm218_vm2, %v2240_v41, 0.0  ;;  %v437_v49 = vsel %vm218_vm2, %v2242_v42, 0.0 }
 0x124   : > { %443 = vadd.xlane.f32.xlu1 %v433_v44  ;;  %441 = vadd.xlane.f32.xlu0 %v432_v45 }
 0x128   : > { %445 = vadd.xlane.f32.xlu1 %v434_v46  ;;  %447 = vadd.xlane.f32.xlu0 %v435_v47 }
 0x12c   : > { %449 = vadd.xlane.f32.xlu1 %v436_v48  ;;  %451 = vadd.xlane.f32.xlu0 %v437_v49 }
 0x130   : > { %453 = vadd.xlane.f32.xlu1 %v438_v50 }
 0x1ad   : > { %v440_v52 = vpop.xlane.xlu0 %439 }
 0x1ae   : > { %v455_v54 = vmul.f32 0.125, %v440_v52 }
 0x1b0   : > { %464 = vst.msk [vmem:[#allocation2] sm:$0xff] %vm463_vm3, %v455_v54  ;;  %v554_v54 = vld [vmem:[#allocation3] sm:$0xff] }
 0x1b1   : > { %v444_v53 = vpop.xlane.xlu1 %443  ;;  %v442_v56 = vpop.xlane.xlu0 %441 }
 0x1b2   : > { %v457_v55 = vmul.f32 0.125, %v444_v53  ;;  %v456_v58 = vmul.f32 0.125, %v442_v56 }
 0x1b4   : > { %466 = vst.msk [vmem:[#allocation2 + $0x10] sm:$0xff] %vm463_vm3, %v457_v55  ;;  %465 = vst.msk [vmem:[#allocation2 + $0x8] sm:$0xff] %vm463_vm3, %v456_v58 }
 0x1b5   : > { %v446_v57 = vpop.xlane.xlu1 %445  ;;  %v448_v60 = vpop.xlane.xlu0 %447 }
 0x1b6   : > { %v458_v59 = vmul.f32 0.125, %v446_v57  ;;  %v459_v62 = vmul.f32 0.125, %v448_v60  ;;  %v555_v57 = vld [vmem:[#allocation3 + $0x8] sm:$0xff]  ;;  %v556_v60 = vld [vmem:[#allocation3 + $0x10] sm:$0xff] }
 0x1b7   : > { %v488_v0 = vld [vmem:[#allocation2] sm:$0xff] }
 0x1b8   : > { %467 = vst.msk [vmem:[#allocation2 + $0x18] sm:$0xff] %vm463_vm3, %v458_v59  ;;  %498 = vperm.xlu0 %1935, %v488_v0   ;;  %468 = vst.msk [vmem:[#allocation2 + $0x20] sm:$0xff] %vm463_vm3, %v459_v62 }
 0x1b9   : > { %v450_v61 = vpop.xlane.xlu1 %449  ;;  %v452_v1 = vpop.xlane.xlu0 %451 }
 0x1ba   : > { %v460_v63 = vmul.f32 0.125, %v450_v61  ;;  %v461_v3 = vmul.f32 0.125, %v452_v1 }
 0x1bb   : > { %v489_v5 = vld [vmem:[#allocation2 + $0x8] sm:$0xff]  ;;  %v490_v6 = vld [vmem:[#allocation2 + $0x10] sm:$0xff] }
 0x1bc   : > { %469 = vst.msk [vmem:[#allocation2 + $0x28] sm:$0xff] %vm463_vm3, %v460_v63  ;;  %503 = vperm.xlu1 %1936, %v489_v5   ;;  %470 = vst.msk [vmem:[#allocation2 + $0x30] sm:$0xff] %vm463_vm3, %v461_v3  ;;  %v557_v63 = vld [vmem:[#allocation3 + $0x18] sm:$0xff]  ;;  %v559_v5 = vld [vmem:[#allocation3 + $0x28] sm:$0xff] }
 0x1bd   : > { %v454_v2 = vpop.xlane.xlu1 %453 }
 0x1be   : > { %v462_v4 = vmul.f32 0.125, %v454_v2  ;;  %v558_v2 = vld [vmem:[#allocation3 + $0x20] sm:$0xff] }
 0x1bf   : > { %v491_v8 = vld [vmem:[#allocation2 + $0x18] sm:$0xff]  ;;  %v492_v9 = vld [vmem:[#allocation2 + $0x20] sm:$0xff] }
 0x1c0   : > { %471 = vst.msk [vmem:[#allocation2 + $0x38] sm:$0xff] %vm463_vm3, %v462_v4  ;;  %508 = vperm.xlu1 %1936, %v490_v6  }
 0x1c3   : > { %v493_v10 = vld [vmem:[#allocation2 + $0x28] sm:$0xff]  ;;  %v494_v11 = vld [vmem:[#allocation2 + $0x30] sm:$0xff] }
 0x1c4   : > { %513 = vperm.xlu1 %1936, %v491_v8  }
 0x1c7   : > { %v495_v12 = vld [vmem:[#allocation2 + $0x38] sm:$0xff] }
 0x1c8   : > { %518 = vperm.xlu1 %1936, %v492_v9   ;;  %v560_v9 = vld [vmem:[#allocation3 + $0x30] sm:$0xff] }
 0x1cc   : > { %523 = vperm.xlu1 %1936, %v493_v10  }
 0x1d0   : > { %528 = vperm.xlu1 %1936, %v494_v11  }
 0x1d4   : > { %533 = vperm.xlu1 %1936, %v495_v12   ;;  %v561_v12 = vld [vmem:[#allocation3 + $0x38] sm:$0xff] }
 0x237   : > { %v499_v14 = vpop.permute.xlu0 %498 }
 0x238   : > { %v536_v15 = vsub.f32 %v2232_v37, %v499_v14 }
 0x23a   : > { %v546_v16 = vsel %vm218_vm2, %v536_v15, 0.0 }
 0x23b   : > { %v504_v17 = vpop.permute.xlu1 %503  ;;  %562 = vadd.xlane.f32.xlu1 %v546_v16  ;;  %v603_v45 = vmul.f32 %v546_v16, %v546_v16 }
 0x23c   : > { %v537_v18 = vsub.f32 %v2228_v35, %v504_v17 }
 0x23e   : > { %v547_v19 = vsel %vm218_vm2, %v537_v18, 0.0  ;;  %v596_v18 = vld [vmem:[#allocation4 + $0x8] sm:$0xff] }
 0x23f   : > { %564 = vadd.xlane.f32.xlu0 %v547_v19  ;;  %v509_v20 = vpop.permute.xlu1 %508  ;;  %v604_v47 = vmul.f32 %v547_v19, %v547_v19  ;;  %v597_v19 = vld [vmem:[#allocation4 + $0x10] sm:$0xff] }
 0x240   : > { %v538_v21 = vsub.f32 %v2240_v41, %v509_v20 }
 0x242   : > { %v548_v22 = vsel %vm218_vm2, %v538_v21, 0.0 }
 0x243   : > { %566 = vadd.xlane.f32.xlu0 %v548_v22  ;;  %v514_v23 = vpop.permute.xlu1 %513  ;;  %v605_v48 = vmul.f32 %v548_v22, %v548_v22 }
 0x244   : > { %v539_v24 = vsub.f32 %v2236_v39, %v514_v23 }
 0x246   : > { %v549_v25 = vsel %vm218_vm2, %v539_v24, 0.0  ;;  %v598_v24 = vld [vmem:[#allocation4 + $0x18] sm:$0xff] }
 0x247   : > { %v519_v26 = vpop.permute.xlu1 %518  ;;  %568 = vadd.xlane.f32.xlu1 %v549_v25  ;;  %v606_v49 = vmul.f32 %v549_v25, %v549_v25  ;;  %v599_v25 = vld [vmem:[#allocation4 + $0x20] sm:$0xff] }
 0x248   : > { %v540_v27 = vsub.f32 %v2234_v38, %v519_v26 }
 0x24a   : > { %v550_v28 = vsel %vm218_vm2, %v540_v27, 0.0 }
 0x24b   : > { %570 = vadd.xlane.f32.xlu0 %v550_v28  ;;  %v524_v29 = vpop.permute.xlu1 %523  ;;  %v607_v50 = vmul.f32 %v550_v28, %v550_v28 }
 0x24c   : > { %v541_v30 = vsub.f32 %v2230_v36, %v524_v29 }
 0x24e   : > { %v551_v31 = vsel %vm218_vm2, %v541_v30, 0.0  ;;  %v600_v30 = vld [vmem:[#allocation4 + $0x28] sm:$0xff] }
 0x24f   : > { %v529_v32 = vpop.permute.xlu1 %528  ;;  %572 = vadd.xlane.f32.xlu1 %v551_v31  ;;  %v608_v51 = vmul.f32 %v551_v31, %v551_v31  ;;  %v601_v31 = vld [vmem:[#allocation4 + $0x30] sm:$0xff] }
 0x250   : > { %v542_v33 = vsub.f32 %v2242_v42, %v529_v32 }
 0x252   : > { %v552_v34 = vsel %vm218_vm2, %v542_v33, 0.0 }
 0x253   : > { %574 = vadd.xlane.f32.xlu0 %v552_v34  ;;  %v534_v43 = vpop.permute.xlu1 %533  ;;  %v609_v52 = vmul.f32 %v552_v34, %v552_v34 }
 0x254   : > { %v543_v44 = vsub.f32 %v2238_v40, %v534_v43 }
 0x256   : > { %v553_v46 = vsel %vm218_vm2, %v543_v44, 0.0  ;;  %v602_v44 = vld [vmem:[#allocation4 + $0x38] sm:$0xff] }
 0x257   : > { %576 = vadd.xlane.f32.xlu1 %v553_v46  ;;  %611 = vadd.xlane.f32.xlu0 %v603_v45  ;;  %v610_v53 = vmul.f32 %v553_v46, %v553_v46 }
 0x25b   : > { %613 = vadd.xlane.f32.xlu1 %v604_v47  ;;  %615 = vadd.xlane.f32.xlu0 %v605_v48 }
 0x25f   : > { %617 = vadd.xlane.f32.xlu1 %v606_v49  ;;  %619 = vadd.xlane.f32.xlu0 %v607_v50 }
 0x263   : > { %621 = vadd.xlane.f32.xlu1 %v608_v51  ;;  %623 = vadd.xlane.f32.xlu0 %v609_v52 }
 0x267   : > { %625 = vadd.xlane.f32.xlu1 %v610_v53 }
 0x2c8   : > { %v563_v55 = vpop.xlane.xlu1 %562 }
 0x2c9   : > { %v578_v56 = vadd.f32 %v563_v55, %v554_v54 }
 0x2cb   : > { %587 = vst.msk [vmem:[#allocation3] sm:$0xff] %vm463_vm3, %v578_v56 }
 0x2cc   : > { %v565_v58 = vpop.xlane.xlu0 %564 }
 0x2cd   : > { %v579_v59 = vadd.f32 %v565_v58, %v555_v57 }
 0x2cf   : > { %588 = vst.msk [vmem:[#allocation3 + $0x8] sm:$0xff] %vm463_vm3, %v579_v59 }
 0x2d0   : > { %v567_v61 = vpop.xlane.xlu0 %566 }
 0x2d1   : > { %v580_v62 = vadd.f32 %v567_v61, %v556_v60 }
 0x2d3   : > { %589 = vst.msk [vmem:[#allocation3 + $0x10] sm:$0xff] %vm463_vm3, %v580_v62 }
 0x2d4   : > { %v569_v0 = vpop.xlane.xlu1 %568 }
 0x2d5   : > { %v581_v1 = vadd.f32 %v569_v0, %v557_v63 }
 0x2d7   : > { %590 = vst.msk [vmem:[#allocation3 + $0x18] sm:$0xff] %vm463_vm3, %v581_v1 }
 0x2d8   : > { %v571_v3 = vpop.xlane.xlu0 %570 }
 0x2d9   : > { %v582_v4 = vadd.f32 %v571_v3, %v558_v2 }
 0x2db   : > { %591 = vst.msk [vmem:[#allocation3 + $0x20] sm:$0xff] %vm463_vm3, %v582_v4 }
 0x2dc   : > { %v573_v6 = vpop.xlane.xlu1 %572 }
 0x2dd   : > { %v583_v8 = vadd.f32 %v573_v6, %v559_v5 }
 0x2df   : > { %592 = vst.msk [vmem:[#allocation3 + $0x28] sm:$0xff] %vm463_vm3, %v583_v8 }
 0x2e0   : > { %v575_v10 = vpop.xlane.xlu0 %574 }
 0x2e1   : > { %v584_v11 = vadd.f32 %v575_v10, %v560_v9 }
 0x2e3   : > { %593 = vst.msk [vmem:[#allocation3 + $0x30] sm:$0xff] %vm463_vm3, %v584_v11 }
 0x2e4   : > { %v577_v14 = vpop.xlane.xlu1 %576  ;;  %v612_v15 = vpop.xlane.xlu0 %611 }
 0x2e5   : > { %v585_v16 = vadd.f32 %v577_v14, %v561_v12  ;;  %v627_v17 = vadd.f32 %v612_v15, %v595_v13 }
 0x2e7   : > { %594 = vst.msk [vmem:[#allocation3 + $0x38] sm:$0xff] %vm463_vm3, %v585_v16  ;;  %635 = vst.msk [vmem:[#allocation4] sm:$0xff] %vm463_vm3, %v627_v17 }
 0x2e8   : > { %v614_v20 = vpop.xlane.xlu1 %613  ;;  %v616_v21 = vpop.xlane.xlu0 %615 }
 0x2e9   : > { %v628_v22 = vadd.f32 %v614_v20, %v596_v18  ;;  %v629_v23 = vadd.f32 %v616_v21, %v597_v19 }
 0x2eb   : > { %636 = vst.msk [vmem:[#allocation4 + $0x8] sm:$0xff] %vm463_vm3, %v628_v22  ;;  %637 = vst.msk [vmem:[#allocation4 + $0x10] sm:$0xff] %vm463_vm3, %v629_v23 }
 0x2ec   : > { %v618_v26 = vpop.xlane.xlu1 %617  ;;  %v620_v27 = vpop.xlane.xlu0 %619 }
 0x2ed   : > { %v630_v28 = vadd.f32 %v618_v26, %v598_v24  ;;  %v631_v29 = vadd.f32 %v620_v27, %v599_v25 }
 0x2ef   : > { %638 = vst.msk [vmem:[#allocation4 + $0x18] sm:$0xff] %vm463_vm3, %v630_v28  ;;  %639 = vst.msk [vmem:[#allocation4 + $0x20] sm:$0xff] %vm463_vm3, %v631_v29 }
 0x2f0   : > { %v622_v32 = vpop.xlane.xlu1 %621  ;;  %v624_v33 = vpop.xlane.xlu0 %623 }
 0x2f1   : > { %v632_v34 = vadd.f32 %v622_v32, %v600_v30  ;;  %v633_v43 = vadd.f32 %v624_v33, %v601_v31 }
 0x2f3   : > { %640 = vst.msk [vmem:[#allocation4 + $0x28] sm:$0xff] %vm463_vm3, %v632_v34  ;;  %641 = vst.msk [vmem:[#allocation4 + $0x30] sm:$0xff] %vm463_vm3, %v633_v43 }
 0x2f4   : > { %v626_v45 = vpop.xlane.xlu1 %625 }
 0x2f5   : > { %v634_v46 = vadd.f32 %v626_v45, %v602_v44 }
 0x2f7   : > { %642 = vst.msk [vmem:[#allocation4 + $0x38] sm:$0xff] %vm463_vm3, %v634_v46 }
 0x2f8 PF: > { %p1636_p5 = scmp.ne.s32.totalorder %s2013_s15, 1 }
 0x2f9   : > { %v670_v47 = vld [vmem:[#allocation3 + $0x18] sm:$0xff] (!%p1636_p5)  ;;  %v2025_v49 = vmov (!%p1636_p5), 0   ;;  %v667_v52 = vld [vmem:[#allocation3] sm:$0xff] (!%p1636_p5)  ;;  %v672_v57 = vld [vmem:[#allocation3 + $0x28] sm:$0xff] (!%p1636_p5)  ;;  %vm763_vm4 = vcmask (!%p1636_p5), 7168   ;;  %vm920_vm5 = vcmask (!%p1636_p5), 523264  }
 0x2fa   : > { %646 = sbr.rel (%p1636_p5) target bundleno = 1626 (0x65a), region = 48  ;;  %v686_v48 = vld [vmem:[#allocation4 + $0x18] sm:$0xff] (!%p1636_p5)  ;;  %1938 = vset.pattern.permute.xlu1 (!%p1636_p5), %v2025_v49  ;;  %1937 = vset.pattern.permute.xlu0 (!%p1636_p5), %v2025_v49  ;;  %v2334_v50 = vmul.f32 (!%p1636_p5), 0.125, %v670_v47  ;;  %v2336_v53 = vmul.f32 (!%p1636_p5), 0.125, %v667_v52  ;;  %v683_v54 = vld [vmem:[#allocation4] sm:$0xff] (!%p1636_p5)  ;;  %v688_v58 = vld [vmem:[#allocation4 + $0x28] sm:$0xff] (!%p1636_p5) }
 0x2fb   : > { %v694_v51 = vmul.f32 (!%p1636_p5), 0.125, %v686_v48  ;;  %v691_v56 = vmul.f32 (!%p1636_p5), 0.125, %v683_v54  ;;  %v2342_v60 = vmul.f32 (!%p1636_p5), 0.125, %v672_v57  ;;  %v696_v61 = vmul.f32 (!%p1636_p5), 0.125, %v688_v58  ;;  %v668_v62 = vld [vmem:[#allocation3 + $0x8] sm:$0xff] (!%p1636_p5)  ;;  %v674_v3 = vld [vmem:[#allocation3 + $0x38] sm:$0xff] (!%p1636_p5) }
 0x2fc   : > { %v702_v55 = vmul.f32 (!%p1636_p5), %v2334_v50, %v2334_v50  ;;  %v699_v59 = vmul.f32 (!%p1636_p5), %v2336_v53, %v2336_v53  ;;  %v684_v63 = vld [vmem:[#allocation4 + $0x8] sm:$0xff] (!%p1636_p5)  ;;  %v2344_v1 = vmul.f32 (!%p1636_p5), 0.125, %v668_v62  ;;  %v2348_v6 = vmul.f32 (!%p1636_p5), 0.125, %v674_v3  ;;  %v669_v12 = vld [vmem:[#allocation3 + $0x10] sm:$0xff] (!%p1636_p5)  ;;  %v671_v17 = vld [vmem:[#allocation3 + $0x20] sm:$0xff] (!%p1636_p5) }
 0x2fd   : > { %v692_v2 = vmul.f32 (!%p1636_p5), 0.125, %v684_v63  ;;  %v704_v5 = vmul.f32 (!%p1636_p5), %v2342_v60, %v2342_v60  ;;  %v685_v13 = vld [vmem:[#allocation4 + $0x10] sm:$0xff] (!%p1636_p5)  ;;  %v2354_v20 = vmul.f32 (!%p1636_p5), 0.125, %v669_v12  ;;  %v687_v22 = vld [vmem:[#allocation4 + $0x20] sm:$0xff] (!%p1636_p5)  ;;  %v2356_v26 = vmul.f32 (!%p1636_p5), 0.125, %v671_v17  ;;  %v726_v52 = vld [vmem:[#allocation2 + $0x18] sm:$0xff] (!%p1636_p5) }
 0x2fe   : > { %v710_v0 = vsub.f32 (!%p1636_p5), %v694_v51, %v702_v55  ;;  %v707_v4 = vsub.f32 (!%p1636_p5), %v691_v56, %v699_v59  ;;  %v690_v8 = vld [vmem:[#allocation4 + $0x38] sm:$0xff] (!%p1636_p5)  ;;  %v700_v10 = vmul.f32 (!%p1636_p5), %v2344_v1, %v2344_v1  ;;  %v706_v16 = vmul.f32 (!%p1636_p5), %v2348_v6, %v2348_v6  ;;  %v673_v29 = vld [vmem:[#allocation3 + $0x30] sm:$0xff] (!%p1636_p5)  ;;  %v723_v56 = vld [vmem:[#allocation2] sm:$0xff] (!%p1636_p5) }
 0x2ff   : > { %v698_v11 = vmul.f32 (!%p1636_p5), 0.125, %v690_v8  ;;  %v712_v15 = vsub.f32 (!%p1636_p5), %v696_v61, %v704_v5  ;;  %v693_v21 = vmul.f32 (!%p1636_p5), 0.125, %v685_v13  ;;  %v701_v28 = vmul.f32 (!%p1636_p5), %v2354_v20, %v2354_v20  ;;  %v689_v30 = vld [vmem:[#allocation4 + $0x30] sm:$0xff] (!%p1636_p5)  ;;  %v654_v58 = vld [vmem:[%s2610_s3 + $0x18] sm:$0xff] (!%p1636_p5)  ;;  %v651_v62 = vld [vmem:[%s2610_s3] sm:$0xff] (!%p1636_p5) }
 0x300   : > { %v718_v9 = vmax.f32 (!%p1636_p5), %v710_v0, 0.0  ;;  %v715_v14 = vmax.f32 (!%p1636_p5), %v707_v4, 0.0  ;;  %v708_v19 = vsub.f32 (!%p1636_p5), %v692_v2, %v700_v10  ;;  %v695_v33 = vmul.f32 (!%p1636_p5), 0.125, %v687_v22  ;;  %v728_v63 = vld [vmem:[#allocation2 + $0x28] sm:$0xff] (!%p1636_p5)  ;;  %v730_v10 = vld [vmem:[#allocation2 + $0x38] sm:$0xff] (!%p1636_p5) }
 0x301   : > { %v720_v24 = vmax.f32 %v712_v15, 0.0  ;;  %v714_v25 = vsub.f32 %v698_v11, %v706_v16  ;;  %v709_v43 = vsub.f32 %v693_v21, %v701_v28  ;;  %v703_v44 = vmul.f32 %v2356_v26, %v2356_v26  ;;  %v724_v4 = vld [vmem:[#allocation2 + $0x8] sm:$0xff]  ;;  %v658_v17 = vld [vmem:[%s2610_s3 + $0x38] sm:$0xff] }
 0x302   : > { %v742_v18 = vadd.f32 1e-05, %v718_v9  ;;  %v739_v23 = vadd.f32 1e-05, %v715_v14  ;;  %v716_v27 = vmax.f32 %v708_v19, 0.0  ;;  %v2362_v46 = vmul.f32 0.125, %v673_v29 }
 0x303   : > { %v744_v31 = vadd.f32 1e-05, %v720_v24  ;;  %v722_v32 = vmax.f32 %v714_v25, 0.0  ;;  %v697_v47 = vmul.f32 0.125, %v689_v30  ;;  %v717_v48 = vmax.f32 %v709_v43, 0.0  ;;  %v656_v9 = vld [vmem:[%s2610_s3 + $0x28] sm:$0xff] }
 0x304   : > { %1939 = vrsqrt.f32 %v742_v18  ;;  %v740_v34 = vadd.f32 1e-05, %v716_v27  ;;  %v711_v49 = vsub.f32 %v695_v33, %v703_v44  ;;  %v705_v51 = vmul.f32 %v2362_v46, %v2362_v46  ;;  %v652_v13 = vld [vmem:[%s2610_s3 + $0x8] sm:$0xff]  ;;  %v653_v29 = vld [vmem:[%s2610_s3 + $0x10] sm:$0xff]  ;;  %v666_v43 = vld [vmem:[%s2610_s3 + $0x78] sm:$0xff] }
 0x305   : > { %1941 = vrsqrt.f32 %v739_v23  ;;  %v746_v45 = vadd.f32 1e-05, %v722_v32  ;;  %v741_v54 = vadd.f32 1e-05, %v717_v48  ;;  %v734_v61 = vadd.f32 %v726_v52, %v2334_v50  ;;  %v725_v23 = vld [vmem:[#allocation2 + $0x10] sm:$0xff]  ;;  %v664_v27 = vld [vmem:[%s2610_s3 + $0x68] sm:$0xff] }
 0x306   : > { %1943 = vrsqrt.f32 %v744_v31  ;;  %v719_v55 = vmax.f32 %v711_v49, 0.0  ;;  %v713_v57 = vsub.f32 %v697_v47, %v705_v51  ;;  %v731_v3 = vadd.f32 %v723_v56, %v2336_v53  ;;  %v662_v53 = vld [vmem:[%s2610_s3 + $0x58] sm:$0xff]  ;;  %v727_v31 = vld [vmem:[#allocation2 + $0x20] sm:$0xff]  ;;  %v729_v52 = vld [vmem:[#allocation2 + $0x30] sm:$0xff] }
 0x307   : > { %1945 = vrsqrt.f32 %v740_v34  ;;  %v736_v12 = vadd.f32 %v728_v63, %v2342_v60  ;;  %v732_v16 = vadd.f32 %v724_v4, %v2344_v1  ;;  %v659_v60 = vld [vmem:[%s2610_s3 + $0x40] sm:$0xff]  ;;  %v738_v22 = vadd.f32 %v730_v10, %v2348_v6  ;;  %v660_v6 = vld [vmem:[%s2610_s3 + $0x48] sm:$0xff]  ;;  %v661_v56 = vld [vmem:[%s2610_s3 + $0x50] sm:$0xff] }
 0x308   : > { %1947 = vrsqrt.f32 %v746_v45  ;;  %v743_v59 = vadd.f32 1e-05, %v719_v55  ;;  %v721_v0 = vmax.f32 %v713_v57, 0.0  ;;  %v733_v33 = vadd.f32 %v725_v23, %v2354_v20  ;;  %v655_v45 = vld [vmem:[%s2610_s3 + $0x20] sm:$0xff]  ;;  %v918_v23 = vld [vmem:[%s2609_s2 + $0x10] sm:$0xff] }
 0x309   : > { %1949 = vrsqrt.f32 %v741_v54  ;;  %v735_v20 = vadd.f32 %v727_v31, %v2356_v26  ;;  %v657_v26 = vld [vmem:[%s2610_s3 + $0x30] sm:$0xff]  ;;  %v663_v63 = vld [vmem:[%s2610_s3 + $0x60] sm:$0xff]  ;;  %1762 = vmatprep.mubr.msk.f32.mxu1 %vm920_vm5, %v918_v23 }
 0x30a   : > { %1951 = vrsqrt.f32 %v743_v59  ;;  %v745_v50 = vadd.f32 1e-05, %v721_v0 }
 0x30c   : > { %1953 = vrsqrt.f32 %v745_v50 }
 0x30e   : > { %v1940_v2 = vpop.eup %1939 }
 0x30f   : > { %v1942_v5 = vpop.eup %1941  ;;  %v758_v8 = vmul.f32 %v1940_v2, %v654_v58 }
 0x310   : > { %v755_v11 = vmul.f32 %v1942_v5, %v651_v62  ;;  %v1944_v14 = vpop.eup %1943  ;;  %v737_v62 = vadd.f32 %v729_v52, %v2362_v46  ;;  %v665_v46 = vld [vmem:[%s2610_s3 + $0x70] sm:$0xff] }
 0x311   : > { %767 = vst.msk [vmem:[#allocation3 + $0x18] sm:$0xff] %vm763_vm4, %v758_v8  ;;  %v775_v15 = vmul.f32 %v758_v8, %v734_v61  ;;  %v1946_v18 = vpop.eup %1945  ;;  %v760_v21 = vmul.f32 %v1944_v14, %v656_v9 }
 0x312   : > { %764 = vst.msk [vmem:[#allocation3] sm:$0xff] %vm763_vm4, %v755_v11  ;;  %v772_v19 = vmul.f32 %v755_v11, %v731_v3  ;;  %v1948_v24 = vpop.eup %1947  ;;  %v756_v25 = vmul.f32 %v1946_v18, %v652_v13 }
 0x313   : > { %v783_v1 = vsub.f32 %v662_v53, %v775_v15  ;;  %769 = vst.msk [vmem:[#allocation3 + $0x28] sm:$0xff] %vm763_vm4, %v760_v21  ;;  %v762_v28 = vmul.f32 %v1948_v24, %v658_v17  ;;  %v777_v32 = vmul.f32 %v760_v21, %v736_v12  ;;  %v1950_v44 = vpop.eup %1949 }
 0x314   : > { %v780_v30 = vsub.f32 %v659_v60, %v772_v19  ;;  %765 = vst.msk [vmem:[#allocation3 + $0x8] sm:$0xff] %vm763_vm4, %v756_v25  ;;  %v773_v34 = vmul.f32 %v756_v25, %v732_v16  ;;  %v757_v49 = vmul.f32 %v1950_v44, %v653_v29  ;;  %v1952_v54 = vpop.eup %1951 }
 0x315   : > { %791 = vst.msk [vmem:[#allocation4 + $0x18] sm:$0xff] %vm763_vm4, %v783_v1  ;;  %771 = vst.msk [vmem:[#allocation3 + $0x38] sm:$0xff] %vm763_vm4, %v762_v28  ;;  %v785_v47 = vsub.f32 %v664_v27, %v777_v32  ;;  %v779_v48 = vmul.f32 %v762_v28, %v738_v22  ;;  %v759_v59 = vmul.f32 %v1952_v54, %v655_v45  ;;  %v916_v22 = vld [vmem:[%s2609_s2] sm:$0xff] }
 0x316   : > { %788 = vst.msk [vmem:[#allocation4] sm:$0xff] %vm763_vm4, %v780_v30  ;;  %v781_v51 = vsub.f32 %v660_v6, %v773_v34  ;;  %766 = vst.msk [vmem:[#allocation3 + $0x10] sm:$0xff] %vm763_vm4, %v757_v49  ;;  %v774_v61 = vmul.f32 %v757_v49, %v733_v33  ;;  %v1954_v0 = vpop.eup %1953  ;;  %1759 = vmatprep.mubr.msk.f32.mxu0 %vm920_vm5, %v916_v22 }
 0x317   : > { %793 = vst.msk [vmem:[#allocation4 + $0x28] sm:$0xff] %vm763_vm4, %v785_v47  ;;  %v787_v57 = vsub.f32 %v666_v43, %v779_v48  ;;  %768 = vst.msk [vmem:[#allocation3 + $0x20] sm:$0xff] %vm763_vm4, %v759_v59  ;;  %v776_v4 = vmul.f32 %v759_v59, %v735_v20  ;;  %v761_v8 = vmul.f32 %v1954_v0, %v657_v26 }
 0x318   : > { %v799_v55 = vld [vmem:[#allocation3 + $0x18] sm:$0xff]  ;;  %789 = vst.msk [vmem:[#allocation4 + $0x8] sm:$0xff] %vm763_vm4, %v781_v51  ;;  %v782_v3 = vsub.f32 %v661_v56, %v774_v61 }
 0x319   : > { %821 = vperm.xlu1 %1938, %v799_v55   ;;  %v796_v58 = vld [vmem:[#allocation3] sm:$0xff]  ;;  %795 = vst.msk [vmem:[#allocation4 + $0x38] sm:$0xff] %vm763_vm4, %v787_v57  ;;  %v784_v9 = vsub.f32 %v663_v63, %v776_v4  ;;  %770 = vst.msk [vmem:[#allocation3 + $0x30] sm:$0xff] %vm763_vm4, %v761_v8  ;;  %v778_v50 = vmul.f32 %v761_v8, %v737_v62 }
 0x31a   : > { %806 = vperm.xlu0 %1937, %v796_v58   ;;  %v801_v2 = vld [vmem:[#allocation3 + $0x28] sm:$0xff]  ;;  %790 = vst.msk [vmem:[#allocation4 + $0x10] sm:$0xff] %vm763_vm4, %v782_v3 }
 0x31b   : > { %v797_v5 = vld [vmem:[#allocation3 + $0x8] sm:$0xff]  ;;  %792 = vst.msk [vmem:[#allocation4 + $0x20] sm:$0xff] %vm763_vm4, %v784_v9  ;;  %v786_v12 = vsub.f32 %v665_v46, %v778_v50 }
 0x31c   : > { %v803_v10 = vld [vmem:[#allocation3 + $0x38] sm:$0xff] }
 0x31d   : > { %831 = vperm.xlu1 %1938, %v801_v2   ;;  %v798_v11 = vld [vmem:[#allocation3 + $0x10] sm:$0xff]  ;;  %v852_v13 = vld [vmem:[#allocation4] sm:$0xff]  ;;  %794 = vst.msk [vmem:[#allocation4 + $0x30] sm:$0xff] %vm763_vm4, %v786_v12  ;;  %v855_v16 = vld [vmem:[#allocation4 + $0x18] sm:$0xff] }
 0x31e   : > { %811 = vperm.xlu0 %1937, %v797_v5   ;;  %v800_v53 = vld [vmem:[#allocation3 + $0x20] sm:$0xff]  ;;  %v857_v60 = vld [vmem:[#allocation4 + $0x28] sm:$0xff] }
 0x31f   : > { %v853_v14 = vld [vmem:[#allocation4 + $0x8] sm:$0xff] }
 0x320   : > { %v802_v15 = vld [vmem:[#allocation3 + $0x30] sm:$0xff]  ;;  %v859_v19 = vld [vmem:[#allocation4 + $0x38] sm:$0xff] }
 0x321   : > { %841 = vperm.xlu1 %1938, %v803_v10   ;;  %v854_v17 = vld [vmem:[#allocation4 + $0x10] sm:$0xff] }
 0x322   : > { %816 = vperm.xlu0 %1937, %v798_v11   ;;  %v856_v18 = vld [vmem:[#allocation4 + $0x20] sm:$0xff] }
 0x324   : > { %v858_v21 = vld [vmem:[#allocation4 + $0x30] sm:$0xff] }
 0x325   : > { %862 = vperm.xlu1 %1938, %v852_v13  }
 0x326   : > { %826 = vperm.xlu0 %1937, %v800_v53   ;;  %v917_v53 = vld [vmem:[%s2609_s2 + $0x8] sm:$0xff] }
 0x329   : > { %867 = vperm.xlu1 %1938, %v853_v14   ;;  %v919_v14 = vld [vmem:[%s2609_s2 + $0x18] sm:$0xff] }
 0x32a   : > { %836 = vperm.xlu0 %1937, %v802_v15  }
 0x32d   : > { %877 = vperm.xlu1 %1938, %v855_v16  }
 0x32e   : > { %872 = vperm.xlu0 %1937, %v854_v17  }
 0x331   : > { %887 = vperm.xlu1 %1938, %v857_v60  }
 0x332   : > { %882 = vperm.xlu0 %1937, %v856_v18  }
 0x335   : > { %897 = vperm.xlu1 %1938, %v859_v19  }
 0x336   : > { %892 = vperm.xlu0 %1937, %v858_v21  }
 0x398   : > { %v822_v24 = vpop.permute.xlu1 %821 }
 0x399   : > { %v807_v25 = vpop.permute.xlu0 %806  ;;  %v847_v45 = vmul.f32 %v2236_v39, %v822_v24 }
 0x39a   : > { %v844_v31 = vmul.f32 %v807_v25, %v2232_v37 }
 0x39c   : > { %v832_v1 = vpop.permute.xlu1 %831 }
 0x39d   : > { %v812_v27 = vpop.permute.xlu0 %811  ;;  %v849_v56 = vmul.f32 %v2230_v36, %v832_v1 }
 0x39e   : > { %v845_v32 = vmul.f32 %v2228_v35, %v812_v27 }
 0x3a0   : > { %v842_v28 = vpop.permute.xlu1 %841 }
 0x3a1   : > { %v817_v29 = vpop.permute.xlu0 %816  ;;  %v851_v2 = vmul.f32 %v2238_v40, %v842_v28 }
 0x3a2   : > { %v846_v49 = vmul.f32 %v817_v29, %v2240_v41 }
 0x3a4   : > { %v863_v30 = vpop.permute.xlu1 %862 }
 0x3a5   : > { %v827_v6 = vpop.permute.xlu0 %826  ;;  %v900_v33 = vadd.f32 %v863_v30, %v844_v31 }
 0x3a6   : > { %v848_v58 = vmul.f32 %v827_v6, %v2234_v38 }
 0x3a7   : > { %v908_v47 = vmax.f32 %v900_v33, 0.0 }
 0x3a8   : > { %v868_v34 = vpop.permute.xlu1 %867 }
 0x3a9   : > { %v901_v43 = vadd.f32 %v868_v34, %v845_v32  ;;  %v837_v44 = vpop.permute.xlu0 %836  ;;  %v2026_v34 = vmov 0.0  }
 0x3aa   : > { %v850_v4 = vmul.f32 %v837_v44, %v2242_v42  ;;  %1045 = vst.msk [vmem:[#allocation6 + $0x8] sm:$0xff] %vm763_vm4, %v2026_v34  ;;  %1044 = vst.msk [vmem:[#allocation6] sm:$0xff] %vm763_vm4, %v2026_v34 }
 0x3ab   : > { %v909_v48 = vmax.f32 %v901_v43, 0.0  ;;  %1046 = vst.msk [vmem:[#allocation6 + $0x10] sm:$0xff] %vm763_vm4, %v2026_v34  ;;  %1047 = vst.msk [vmem:[#allocation6 + $0x18] sm:$0xff] %vm763_vm4, %v2026_v34 }
 0x3ac   : > { %v878_v20 = vpop.permute.xlu1 %877  ;;  %1048 = vst.msk [vmem:[#allocation7] sm:$0xff] %vm763_vm4, %v2026_v34  ;;  %1049 = vst.msk [vmem:[#allocation7 + $0x8] sm:$0xff] %vm763_vm4, %v2026_v34 }
 0x3ad   : > { %v1835_v51 = vpack.c.bf16 %v909_v48, %v908_v47  ;;  %v903_v52 = vadd.f32 %v878_v20, %v847_v45  ;;  %v873_v54 = vpop.permute.xlu0 %872  ;;  %1050 = vst.msk [vmem:[#allocation7 + $0x10] sm:$0xff] %vm763_vm4, %v2026_v34  ;;  %1051 = vst.msk [vmem:[#allocation7 + $0x18] sm:$0xff] %vm763_vm4, %v2026_v34 }
 0x3ae   : > { %v902_v55 = vadd.f32 %v873_v54, %v846_v49 }
 0x3af   : > { %v911_v57 = vmax.f32 %v903_v52, 0.0  ;;  %1836 = vmatprep.subr.bf16.mxu0 %v1835_v51  ;;  %1883 = vmatprep.subr.bf16.mxu1 %v1835_v51 }
 0x3b0   : > { %v910_v59 = vmax.f32 %v902_v55, 0.0  ;;  %v888_v26 = vpop.permute.xlu1 %887  ;;  %1838 = vmatpush3.bf16.msra.mxu0 %v1835_v51  ;;  %1887 = vmatpush3.bf16.msra.mxu1 %v1835_v51 }
 0x3b1   : > { %v905_v61 = vadd.f32 %v888_v26, %v849_v56  ;;  %v883_v62 = vpop.permute.xlu0 %882 }
 0x3b2   : > { %v1839_v63 = vpack.c.bf16 %v911_v57, %v910_v59  ;;  %v904_v0 = vadd.f32 %v883_v62, %v848_v58  ;;  %v1089_v7 = vld [vmem:[#allocation6 + $0x18] sm:$0xff] }
 0x3b3   : > { %v913_v3 = vmax.f32 %v905_v61, 0.0  ;;  %v1087_v61 = vld [vmem:[#allocation6 + $0x8] sm:$0xff] }
 0x3b4   : > { %v912_v5 = vmax.f32 %v904_v0, 0.0  ;;  %1840 = vmatprep.subr.bf16.mxu0 %v1839_v63  ;;  %1884 = vmatprep.subr.bf16.mxu1 %v1839_v63  ;;  %v898_v8 = vpop.permute.xlu1 %897  ;;  %v1107_v0 = vld [vmem:[#allocation7] sm:$0xff] }
 0x3b5   : > { %v907_v9 = vadd.f32 %v898_v8, %v851_v2  ;;  %1842 = vmatpush3.bf16.msra.mxu0 %v1839_v63  ;;  %1888 = vmatpush3.bf16.msra.mxu1 %v1839_v63  ;;  %v893_v46 = vpop.permute.xlu0 %892 }
 0x3b6   : > { %v1843_v10 = vpack.c.bf16 %v913_v3, %v912_v5  ;;  %v906_v50 = vadd.f32 %v893_v46, %v850_v4  ;;  %v1109_v4 = vld [vmem:[#allocation7 + $0x10] sm:$0xff] }
 0x3b7   : > { %v915_v11 = vmax.f32 %v907_v9, 0.0 }
 0x3b8   : > { %v914_v12 = vmax.f32 %v906_v50, 0.0  ;;  %1844 = vmatprep.subr.bf16.mxu0 %v1843_v10  ;;  %1885 = vmatprep.subr.bf16.mxu1 %v1843_v10 }
 0x3b9   : > { %1846 = vmatpush3.bf16.msra.mxu0 %v1843_v10  ;;  %1889 = vmatpush3.bf16.msra.mxu1 %v1843_v10  ;;  %v1086_v10 = vld [vmem:[#allocation6] sm:$0xff] }
 0x3ba   : > { %v1847_v13 = vpack.c.bf16 %v915_v11, %v914_v12  ;;  %v1088_v12 = vld [vmem:[#allocation6 + $0x10] sm:$0xff] }
 0x3bc   : > { %1848 = vmatprep.subr.bf16.mxu0 %v1847_v13  ;;  %1886 = vmatprep.subr.bf16.mxu1 %v1847_v13 }
 0x3bd   : > { %1850 = vmatpush3.bf16.msra.mxu0 %v1847_v13  ;;  %1890 = vmatpush3.bf16.msra.mxu1 %v1847_v13 }
 0x3c0   : > { %1760 = vmatmul.mubr.msk.f32.vlgmr.msra.gmra.mrb[0].mxu0 %vm920_vm5, %v917_v53  ;;  %1763 = vmatmul.mubr.msk.f32.vlgmr.msra.gmra.mrb[0].mxu1 %vm920_vm5, %v919_v14  ;;  %v1108_v14 = vld [vmem:[#allocation7 + $0x8] sm:$0xff] }
 0x493   : > { %v1761_v15 = vpop.f32.mrb[0].mxu0  ;;  %v1764_v16 = vpop.f32.mrb[0].mxu1 }
 0x494   : > { %v999_v17 = vpop.f32.mrb[1].mxu0  ;;  %v1024_v60 = vsel %vm218_vm2, %v1761_v15, 0.0  ;;  %v1009_v18 = vpop.f32.mrb[1].mxu1  ;;  %v1026_v22 = vsel %vm218_vm2, %v1764_v16, 0.0 }
 0x495   : > { %1029 = vadd.xlane.f32.xlu1 %v1024_v60  ;;  %v1023_v19 = vsel %vm218_vm2, %v999_v17, 0.0  ;;  %v1025_v21 = vsel %vm218_vm2, %v1009_v18, 0.0 }
 0x496   : > { %1027 = vadd.xlane.f32.xlu0 %v1023_v19 }
 0x49a   : > { %1031 = vadd.xlane.f32.xlu0 %v1025_v21 }
 0x49e   : > { %1033 = vadd.xlane.f32.xlu0 %v1026_v22 }
 0x522   : > { %v1030_v23 = vpop.xlane.xlu1 %1029 }
 0x523   : > { %v1036_v24 = vmul.f32 0.125, %v1030_v23  ;;  %v1028_v25 = vpop.xlane.xlu0 %1027 }
 0x524   : > { %v1035_v1 = vmul.f32 0.125, %v1028_v25 }
 0x525   : > { %1041 = vst.msk [vmem:[#allocation5 + $0x8] sm:$0xff] %vm763_vm4, %v1036_v24 }
 0x526   : > { %1040 = vst.msk [vmem:[#allocation5] sm:$0xff] %vm763_vm4, %v1035_v1 }
 0x527   : > { %v1032_v27 = vpop.xlane.xlu0 %1031 }
 0x528   : > { %v1037_v28 = vmul.f32 0.125, %v1032_v27 }
 0x52a   : > { %1042 = vst.msk [vmem:[#allocation5 + $0x10] sm:$0xff] %vm763_vm4, %v1037_v28 }
 0x52b   : > { %v1034_v29 = vpop.xlane.xlu0 %1033 }
 0x52c   : > { %v1038_v30 = vmul.f32 0.125, %v1034_v29  ;;  %v1053_v31 = vld [vmem:[#allocation5 + $0x8] sm:$0xff] }
 0x52d   : > { %1063 = vperm.xlu0 %1937, %v1053_v31   ;;  %v1052_v6 = vld [vmem:[#allocation5] sm:$0xff] }
 0x52e   : > { %1043 = vst.msk [vmem:[#allocation5 + $0x18] sm:$0xff] %vm763_vm4, %v1038_v30  ;;  %1058 = vperm.xlu1 %1938, %v1052_v6  }
 0x531   : > { %v1054_v32 = vld [vmem:[#allocation5 + $0x10] sm:$0xff] }
 0x532   : > { %1068 = vperm.xlu1 %1938, %v1054_v32  }
 0x535   : > { %v1055_v33 = vld [vmem:[#allocation5 + $0x18] sm:$0xff] }
 0x536   : > { %1073 = vperm.xlu1 %1938, %v1055_v33  }
 0x5ac   : > { %v1064_v43 = vpop.permute.xlu0 %1063 }
 0x5ad   : > { %v1077_v44 = vsub.f32 %v1761_v15, %v1064_v43  ;;  %v1059_v45 = vpop.permute.xlu1 %1058 }
 0x5ae   : > { %v1076_v47 = vsub.f32 %v999_v17, %v1059_v45  ;;  %v1110_v17 = vld [vmem:[#allocation7 + $0x18] sm:$0xff] }
 0x5af   : > { %v1083_v48 = vsel %vm218_vm2, %v1077_v44, 0.0 }
 0x5b0   : > { %v1082_v49 = vsel %vm218_vm2, %v1076_v47, 0.0  ;;  %1092 = vadd.xlane.f32.xlu1 %v1083_v48  ;;  %v1112_v59 = vmul.f32 %v1083_v48, %v1083_v48 }
 0x5b1   : > { %v1069_v20 = vpop.permute.xlu1 %1068  ;;  %v1111_v51 = vmul.f32 %v1082_v49, %v1082_v49 }
 0x5b2   : > { %v1078_v52 = vsub.f32 %v1009_v18, %v1069_v20 }
 0x5b4   : > { %v1084_v54 = vsel %vm218_vm2, %v1078_v52, 0.0  ;;  %1115 = vadd.xlane.f32.xlu1 %v1111_v51 }
 0x5b5   : > { %v1074_v55 = vpop.permute.xlu1 %1073  ;;  %v1113_v56 = vmul.f32 %v1084_v54, %v1084_v54 }
 0x5b6   : > { %v1079_v57 = vsub.f32 %v1764_v16, %v1074_v55 }
 0x5b8   : > { %1119 = vadd.xlane.f32.xlu1 %v1113_v56  ;;  %v1085_v58 = vsel %vm218_vm2, %v1079_v57, 0.0 }
 0x5b9   : > { %1096 = vadd.xlane.f32.xlu0 %v1085_v58  ;;  %v1114_v26 = vmul.f32 %v1085_v58, %v1085_v58 }
 0x5bd   : > { %1090 = vadd.xlane.f32.xlu0 %v1082_v49 }
 0x5c1   : > { %1094 = vadd.xlane.f32.xlu0 %v1084_v54 }
 0x5c5   : > { %1117 = vadd.xlane.f32.xlu0 %v1112_v59 }
 0x5c9   : > { %1121 = vadd.xlane.f32.xlu0 %v1114_v26 }
 0x63d   : > { %v1093_v62 = vpop.xlane.xlu1 %1092 }
 0x63e   : > { %v1099_v63 = vadd.f32 %v1093_v62, %v1087_v61 }
 0x640   : > { %1104 = vst.msk [vmem:[#allocation6 + $0x8] sm:$0xff] %vm763_vm4, %v1099_v63 }
 0x641   : > { %v1116_v2 = vpop.xlane.xlu1 %1115 }
 0x642   : > { %v1123_v3 = vadd.f32 %v1116_v2, %v1107_v0 }
 0x644   : > { %1127 = vst.msk [vmem:[#allocation7] sm:$0xff] %vm763_vm4, %v1123_v3 }
 0x645   : > { %v1120_v5 = vpop.xlane.xlu1 %1119 }
 0x646   : > { %v1125_v8 = vadd.f32 %v1120_v5, %v1109_v4  ;;  %v1097_v9 = vpop.xlane.xlu0 %1096 }
 0x647   : > { %v1101_v46 = vadd.f32 %v1097_v9, %v1089_v7 }
 0x648   : > { %1129 = vst.msk [vmem:[#allocation7 + $0x10] sm:$0xff] %vm763_vm4, %v1125_v8 }
 0x649   : > { %1106 = vst.msk [vmem:[#allocation6 + $0x18] sm:$0xff] %vm763_vm4, %v1101_v46 }
 0x64a   : > { %v1091_v50 = vpop.xlane.xlu0 %1090 }
 0x64b   : > { %v1098_v11 = vadd.f32 %v1091_v50, %v1086_v10 }
 0x64d   : > { %1103 = vst.msk [vmem:[#allocation6] sm:$0xff] %vm763_vm4, %v1098_v11 }
 0x64e   : > { %v1095_v13 = vpop.xlane.xlu0 %1094 }
 0x64f   : > { %v1100_v53 = vadd.f32 %v1095_v13, %v1088_v12 }
 0x651   : > { %1105 = vst.msk [vmem:[#allocation6 + $0x10] sm:$0xff] %vm763_vm4, %v1100_v53 }
 0x652   : > { %v1118_v15 = vpop.xlane.xlu0 %1117 }
 0x653   : > { %v1124_v16 = vadd.f32 %v1118_v15, %v1108_v14 }
 0x655   : > { %1128 = vst.msk [vmem:[#allocation7 + $0x8] sm:$0xff] %vm763_vm4, %v1124_v16 }
 0x656   : > { %v1122_v60 = vpop.xlane.xlu0 %1121 }
 0x657   : > { %v1126_v18 = vadd.f32 %v1122_v60, %v1110_v17 }
 0x659   : > { %1130 = vst.msk [vmem:[#allocation7 + $0x18] sm:$0xff] %vm763_vm4, %v1126_v18 }
 0x65a PF: > { %p1641_p6 = scmp.ne.s32.totalorder %s2013_s15, 2 }
 0x65b   : > { %v1268_v19 = vld [vmem:[#allocation4] sm:$0xff] (!%p1641_p6)  ;;  %v2027_v22 = vmov (!%p1641_p6), 0   ;;  %v1269_v23 = vld [vmem:[#allocation4 + $0x8] sm:$0xff] (!%p1641_p6)  ;;  %v1215_v1 = vld [vmem:[#allocation3 + $0x18] sm:$0xff] (!%p1641_p6)  ;;  %vm1195_vm6 = vcmask (!%p1641_p6), 7168   ;;  %vm1336_vm7 = vcmask (!%p1641_p6), 523264  }
 0x65c   : > { %1134 = sbr.rel (%p1641_p6) target bundleno = 2063 (0x80f), region = 60  ;;  %v1212_v21 = vld [vmem:[#allocation3] sm:$0xff] (!%p1641_p6)  ;;  %1956 = vset.pattern.permute.xlu1 (!%p1641_p6), %v2027_v22  ;;  %1955 = vset.pattern.permute.xlu0 (!%p1641_p6), %v2027_v22  ;;  %v1213_v24 = vld [vmem:[#allocation3 + $0x8] sm:$0xff] (!%p1641_p6)  ;;  %v1214_v29 = vld [vmem:[#allocation3 + $0x10] sm:$0xff] (!%p1641_p6) }
 0x65d   : > { %1278 = vperm.xlu1 (!%p1641_p6), %1956, %v1268_v19   ;;  %1222 = vperm.xlu0 (!%p1641_p6), %1955, %v1212_v21   ;;  %v1148_v25 = vld [vmem:[#allocation6 + $0x8] sm:$0xff] (!%p1641_p6)  ;;  %v1147_v31 = vld [vmem:[#allocation6] sm:$0xff] (!%p1641_p6)  ;;  %v1149_v43 = vld [vmem:[#allocation6 + $0x10] sm:$0xff] (!%p1641_p6) }
 0x65e   : > { %v1152_v27 = vmul.f32 (!%p1641_p6), 0.125, %v1148_v25  ;;  %v1156_v28 = vld [vmem:[#allocation7 + $0x8] sm:$0xff] (!%p1641_p6)  ;;  %v1155_v6 = vld [vmem:[#allocation7] sm:$0xff] (!%p1641_p6)  ;;  %v1151_v33 = vmul.f32 (!%p1641_p6), 0.125, %v1147_v31  ;;  %v1153_v44 = vmul.f32 (!%p1641_p6), 0.125, %v1149_v43  ;;  %v1157_v45 = vld [vmem:[#allocation7 + $0x10] sm:$0xff] (!%p1641_p6) }
 0x65f   : > { %v1160_v30 = vmul.f32 (!%p1641_p6), 0.125, %v1156_v28  ;;  %v1159_v34 = vmul.f32 (!%p1641_p6), 0.125, %v1155_v6  ;;  %v1161_v49 = vmul.f32 (!%p1641_p6), 0.125, %v1157_v45  ;;  %v1150_v20 = vld [vmem:[#allocation6 + $0x18] sm:$0xff] (!%p1641_p6)  ;;  %v1270_v54 = vld [vmem:[#allocation4 + $0x10] sm:$0xff] (!%p1641_p6)  ;;  %v1217_v0 = vld [vmem:[#allocation3 + $0x28] sm:$0xff] (!%p1641_p6) }
 0x660   : > { %v1164_v32 = vmul.f32 (!%p1641_p6), %v1152_v27, %v1152_v27  ;;  %v1163_v48 = vmul.f32 (!%p1641_p6), %v1151_v33, %v1151_v33  ;;  %v1158_v51 = vld [vmem:[#allocation7 + $0x18] sm:$0xff] (!%p1641_p6)  ;;  %v1165_v55 = vmul.f32 (!%p1641_p6), %v1153_v44, %v1153_v44  ;;  %v1154_v56 = vmul.f32 (!%p1641_p6), 0.125, %v1150_v20  ;;  %v1216_v2 = vld [vmem:[#allocation3 + $0x20] sm:$0xff] (!%p1641_p6)  ;;  %v1273_v9 = vld [vmem:[#allocation4 + $0x28] sm:$0xff] (!%p1641_p6) }
 0x661   : > { %1283 = vperm.xlu1 (!%p1641_p6), %1956, %v1269_v23   ;;  %1227 = vperm.xlu0 (!%p1641_p6), %1955, %v1213_v24   ;;  %v1271_v52 = vld [vmem:[#allocation4 + $0x18] sm:$0xff] (!%p1641_p6)  ;;  %v1162_v57 = vmul.f32 (!%p1641_p6), 0.125, %v1158_v51  ;;  %v1272_v46 = vld [vmem:[#allocation4 + $0x20] sm:$0xff] (!%p1641_p6)  ;;  %v1176_v50 = vld [vmem:[#allocation5 + $0x8] sm:$0xff] (!%p1641_p6) }
 0x662   : > { %v1168_v47 = vsub.f32 (!%p1641_p6), %v1160_v30, %v1164_v32  ;;  %v1167_v59 = vsub.f32 (!%p1641_p6), %v1159_v34, %v1163_v48  ;;  %v1169_v26 = vsub.f32 (!%p1641_p6), %v1161_v49, %v1165_v55  ;;  %v1166_v61 = vmul.f32 (!%p1641_p6), %v1154_v56, %v1154_v56  ;;  %v1219_v11 = vld [vmem:[#allocation3 + $0x38] sm:$0xff] (!%p1641_p6)  ;;  %v1218_v12 = vld [vmem:[#allocation3 + $0x30] sm:$0xff] (!%p1641_p6)  ;;  %v1140_v13 = vld [vmem:[%s2610_s3 + $0x88] sm:$0xff] (!%p1641_p6) }
 0x663   : > { %v1175_v53 = vld [vmem:[#allocation5] sm:$0xff]  ;;  %v1180_v14 = vadd.f32 %v1176_v50, %v1152_v27  ;;  %v1177_v15 = vld [vmem:[#allocation5 + $0x10] sm:$0xff]  ;;  %v1275_v17 = vld [vmem:[#allocation4 + $0x38] sm:$0xff] }
 0x664   : > { %v1172_v58 = vmax.f32 %v1168_v47, 0.0  ;;  %v1171_v63 = vmax.f32 %v1167_v59, 0.0  ;;  %v1173_v3 = vmax.f32 %v1169_v26, 0.0  ;;  %v1170_v4 = vsub.f32 %v1162_v57, %v1166_v61  ;;  %v1139_v60 = vld [vmem:[%s2610_s3 + $0x80] sm:$0xff]  ;;  %v1274_v18 = vld [vmem:[#allocation4 + $0x30] sm:$0xff]  ;;  %v1178_v23 = vld [vmem:[#allocation5 + $0x18] sm:$0xff] }
 0x665   : > { %1237 = vperm.xlu1 %1956, %v1215_v1   ;;  %1232 = vperm.xlu0 %1955, %v1214_v29   ;;  %v1179_v21 = vadd.f32 %v1175_v53, %v1151_v33  ;;  %v1141_v22 = vld [vmem:[%s2610_s3 + $0x90] sm:$0xff]  ;;  %v1181_v25 = vadd.f32 %v1177_v15, %v1153_v44  ;;  %v1144_v1 = vld [vmem:[%s2610_s3 + $0xa8] sm:$0xff]  ;;  %v1142_v29 = vld [vmem:[%s2610_s3 + $0x98] sm:$0xff]  ;;  %v1182_v32 = vadd.f32 %v1178_v23, %v1154_v56 }
 0x666   : > { %v1184_v62 = vadd.f32 1e-05, %v1172_v58  ;;  %v1183_v7 = vadd.f32 1e-05, %v1171_v63  ;;  %v1185_v5 = vadd.f32 1e-05, %v1173_v3 }
 0x667   : > { %v1174_v8 = vmax.f32 %v1170_v4, 0.0  ;;  %v1143_v31 = vld [vmem:[%s2610_s3 + $0xa0] sm:$0xff]  ;;  %v1145_v44 = vld [vmem:[%s2610_s3 + $0xb0] sm:$0xff]  ;;  %v1146_v49 = vld [vmem:[%s2610_s3 + $0xb8] sm:$0xff] }
 0x668   : > { %1957 = vrsqrt.f32 %v1184_v62  ;;  %v1332_v58 = vld [vmem:[%s2609_s2] sm:$0xff]  ;;  %v1334_v59 = vld [vmem:[%s2609_s2 + $0x10] sm:$0xff]  ;;  %v1497_v3 = vld [vmem:[%s2610_s3 + $0xd8] sm:$0xff] }
 0x669   : > { %1293 = vperm.xlu1 %1956, %v1271_v52   ;;  %1288 = vperm.xlu0 %1955, %v1270_v54   ;;  %1959 = vrsqrt.f32 %v1183_v7  ;;  %v1186_v10 = vadd.f32 1e-05, %v1174_v8  ;;  %v1496_v4 = vld [vmem:[%s2610_s3 + $0xd0] sm:$0xff]  ;;  %v1498_v7 = vld [vmem:[%s2610_s3 + $0xe0] sm:$0x1] }
 0x66a   : > { %1961 = vrsqrt.f32 %v1185_v5  ;;  %1781 = vmatprep.mubr.msk.f32.mxu0 %vm1336_vm7, %v1332_v58  ;;  %1784 = vmatprep.mubr.msk.f32.mxu1 %vm1336_vm7, %v1334_v59 }
 0x66b   : > { %1963 = vrsqrt.f32 %v1186_v10 }
 0x66d   : > { %1247 = vperm.xlu1 %1956, %v1217_v0   ;;  %1242 = vperm.xlu0 %1955, %v1216_v2   ;;  %v1495_v0 = vld [vmem:[%s2610_s3 + $0xc8] sm:$0xff]  ;;  %v1494_v2 = vld [vmem:[%s2610_s3 + $0xc0] sm:$0xff] }
 0x671   : > { %1303 = vperm.xlu1 %1956, %v1273_v9   ;;  %1298 = vperm.xlu0 %1955, %v1272_v46  }
 0x672   : > { %v1958_v16 = vpop.eup %1957 }
 0x673   : > { %v1192_v19 = vmul.f32 %v1958_v16, %v1140_v13  ;;  %v1960_v24 = vpop.eup %1959 }
 0x674   : > { %v1962_v27 = vpop.eup %1961  ;;  %v1191_v28 = vmul.f32 %v1960_v24, %v1139_v60 }
 0x675   : > { %1257 = vperm.xlu1 %1956, %v1219_v11   ;;  %1252 = vperm.xlu0 %1955, %v1218_v12   ;;  %1197 = vst.msk [vmem:[#allocation6 + $0x8] sm:$0xff] %vm1195_vm6, %v1192_v19  ;;  %v1201_v30 = vmul.f32 %v1192_v19, %v1180_v14  ;;  %v1193_v6 = vmul.f32 %v1962_v27, %v1141_v22  ;;  %v1964_v33 = vpop.eup %1963 }
 0x676   : > { %1196 = vst.msk [vmem:[#allocation6] sm:$0xff] %vm1195_vm6, %v1191_v28  ;;  %v1200_v34 = vmul.f32 %v1191_v28, %v1179_v21  ;;  %v1194_v45 = vmul.f32 %v1964_v33, %v1142_v29 }
 0x677   : > { %v1205_v43 = vsub.f32 %v1144_v1, %v1201_v30  ;;  %1198 = vst.msk [vmem:[#allocation6 + $0x10] sm:$0xff] %vm1195_vm6, %v1193_v6  ;;  %v1202_v47 = vmul.f32 %v1193_v6, %v1181_v25 }
 0x678   : > { %v1204_v48 = vsub.f32 %v1143_v31, %v1200_v34  ;;  %1199 = vst.msk [vmem:[#allocation6 + $0x18] sm:$0xff] %vm1195_vm6, %v1194_v45  ;;  %v1203_v20 = vmul.f32 %v1194_v45, %v1182_v32 }
 0x679   : > { %1313 = vperm.xlu1 %1956, %v1275_v17   ;;  %1308 = vperm.xlu0 %1955, %v1274_v18   ;;  %1209 = vst.msk [vmem:[#allocation7 + $0x8] sm:$0xff] %vm1195_vm6, %v1205_v43  ;;  %v1206_v51 = vsub.f32 %v1145_v44, %v1202_v47 }
 0x67a   : > { %1208 = vst.msk [vmem:[#allocation7] sm:$0xff] %vm1195_vm6, %v1204_v48  ;;  %v1207_v54 = vsub.f32 %v1146_v49, %v1203_v20 }
 0x67b   : > { %1210 = vst.msk [vmem:[#allocation7 + $0x10] sm:$0xff] %vm1195_vm6, %v1206_v51 }
 0x67c   : > { %v1435_v52 = vld [vmem:[#allocation6 + $0x8] sm:$0xff]  ;;  %1211 = vst.msk [vmem:[#allocation7 + $0x18] sm:$0xff] %vm1195_vm6, %v1207_v54 }
 0x67d   : > { %1445 = vperm.xlu1 %1956, %v1435_v52   ;;  %v1434_v55 = vld [vmem:[#allocation6] sm:$0xff] }
 0x67e   : > { %1440 = vperm.xlu0 %1955, %v1434_v55   ;;  %v1436_v56 = vld [vmem:[#allocation6 + $0x10] sm:$0xff] }
 0x67f   : > { %v1437_v26 = vld [vmem:[#allocation6 + $0x18] sm:$0xff] }
 0x680   : > { %v1463_v61 = vld [vmem:[#allocation7 + $0x8] sm:$0xff] }
 0x681   : > { %v1462_v57 = vld [vmem:[#allocation7] sm:$0xff] }
 0x682   : > { %1468 = vperm.xlu1 %1956, %v1462_v57   ;;  %1450 = vperm.xlu0 %1955, %v1436_v56   ;;  %v1464_v63 = vld [vmem:[#allocation7 + $0x10] sm:$0xff] }
 0x683   : > { %v1465_v62 = vld [vmem:[#allocation7 + $0x18] sm:$0xff] }
 0x686   : > { %1455 = vperm.xlu1 %1956, %v1437_v26   ;;  %1473 = vperm.xlu0 %1955, %v1463_v61  }
 0x68a   : > { %1483 = vperm.xlu1 %1956, %v1465_v62   ;;  %1478 = vperm.xlu0 %1955, %v1464_v63  }
 0x68e   : > { %1506 = vperm.xlu1 %1956, %v1495_v0   ;;  %1501 = vperm.xlu0 %1955, %v1494_v2  }
 0x692   : > { %1516 = vperm.xlu1 %1956, %v1497_v3   ;;  %1511 = vperm.xlu0 %1955, %v1496_v4  }
 0x696   : > { %1534 = vperm.xlu0 %1955, %v1498_v7  }
 0x6dc   : > { %v1279_v5 = vpop.permute.xlu1 %1278  ;;  %v1223_v8 = vpop.permute.xlu0 %1222 }
 0x6dd   : > { %v1260_v9 = vmul.f32 %v1223_v8, %v2232_v37 }
 0x6df   : > { %v1316_v50 = vadd.f32 %v1279_v5, %v1260_v9 }
 0x6e0   : > { %v1284_v46 = vpop.permute.xlu1 %1283  ;;  %v1228_v10 = vpop.permute.xlu0 %1227 }
 0x6e1   : > { %v1261_v11 = vmul.f32 %v2228_v35, %v1228_v10  ;;  %v1324_v14 = vmax.f32 %v1316_v50, 0.0 }
 0x6e3   : > { %v1317_v12 = vadd.f32 %v1284_v46, %v1261_v11 }
 0x6e4   : > { %v1238_v13 = vpop.permute.xlu1 %1237  ;;  %v1233_v53 = vpop.permute.xlu0 %1232 }
 0x6e5   : > { %v1325_v15 = vmax.f32 %v1317_v12, 0.0  ;;  %v1263_v17 = vmul.f32 %v2236_v39, %v1238_v13  ;;  %v1262_v60 = vmul.f32 %v1233_v53, %v2240_v41 }
 0x6e7   : > { %v1851_v16 = vpack.c.bf16 %v1325_v15, %v1324_v14 }
 0x6e8   : > { %v1294_v18 = vpop.permute.xlu1 %1293  ;;  %v1289_v19 = vpop.permute.xlu0 %1288 }
 0x6e9   : > { %v1319_v21 = vadd.f32 %v1294_v18, %v1263_v17  ;;  %v1318_v22 = vadd.f32 %v1289_v19, %v1262_v60  ;;  %1852 = vmatprep.subr.bf16.mxu0 %v1851_v16  ;;  %1891 = vmatprep.subr.bf16.mxu1 %v1851_v16 }
 0x6ea   : > { %1854 = vmatpush3.bf16.msra.mxu0 %v1851_v16  ;;  %1895 = vmatpush3.bf16.msra.mxu1 %v1851_v16 }
 0x6eb   : > { %v1327_v37 = vmax.f32 %v1319_v21, 0.0  ;;  %v1326_v35 = vmax.f32 %v1318_v22, 0.0 }
 0x6ec   : > { %v1248_v23 = vpop.permute.xlu1 %1247  ;;  %v1243_v24 = vpop.permute.xlu0 %1242 }
 0x6ed   : > { %v1855_v25 = vpack.c.bf16 %v1327_v37, %v1326_v35  ;;  %v1265_v1 = vmul.f32 %v2230_v36, %v1248_v23  ;;  %v1264_v27 = vmul.f32 %v1243_v24, %v2234_v38 }
 0x6ef   : > { %1856 = vmatprep.subr.bf16.mxu0 %v1855_v25  ;;  %1892 = vmatprep.subr.bf16.mxu1 %v1855_v25 }
 0x6f0   : > { %v1304_v39 = vpop.permute.xlu1 %1303  ;;  %1858 = vmatpush3.bf16.msra.mxu0 %v1855_v25  ;;  %1896 = vmatpush3.bf16.msra.mxu1 %v1855_v25  ;;  %v1299_v41 = vpop.permute.xlu0 %1298 }
 0x6f1   : > { %v1321_v28 = vadd.f32 %v1304_v39, %v1265_v1  ;;  %v1320_v29 = vadd.f32 %v1299_v41, %v1264_v27 }
 0x6f3   : > { %v1329_v30 = vmax.f32 %v1321_v28, 0.0  ;;  %v1328_v31 = vmax.f32 %v1320_v29, 0.0 }
 0x6f4   : > { %v1258_v6 = vpop.permute.xlu1 %1257  ;;  %v1253_v32 = vpop.permute.xlu0 %1252 }
 0x6f5   : > { %v1859_v33 = vpack.c.bf16 %v1329_v30, %v1328_v31  ;;  %v1267_v34 = vmul.f32 %v2238_v40, %v1258_v6  ;;  %v1266_v43 = vmul.f32 %v1253_v32, %v2242_v42  ;;  %v1333_v40 = vld [vmem:[%s2609_s2 + $0x8] sm:$0xff]  ;;  %v1335_v42 = vld [vmem:[%s2609_s2 + $0x18] sm:$0xff] }
 0x6f7   : > { %1860 = vmatprep.subr.bf16.mxu0 %v1859_v33  ;;  %1893 = vmatprep.subr.bf16.mxu1 %v1859_v33 }
 0x6f8   : > { %v1314_v36 = vpop.permute.xlu1 %1313  ;;  %1862 = vmatpush3.bf16.msra.mxu0 %v1859_v33  ;;  %1897 = vmatpush3.bf16.msra.mxu1 %v1859_v33  ;;  %v1309_v38 = vpop.permute.xlu0 %1308 }
 0x6f9   : > { %v1323_v44 = vadd.f32 %v1314_v36, %v1267_v34  ;;  %v1322_v45 = vadd.f32 %v1309_v38, %v1266_v43 }
 0x6fb   : > { %v1331_v47 = vmax.f32 %v1323_v44, 0.0  ;;  %v1330_v48 = vmax.f32 %v1322_v45, 0.0 }
 0x6fc   : > { %v1446_v51 = vpop.permute.xlu1 %1445 }
 0x6fd   : > { %v1863_v49 = vpack.c.bf16 %v1331_v47, %v1330_v48  ;;  %v1441_v20 = vpop.permute.xlu0 %1440 }
 0x6ff   : > { %1864 = vmatprep.subr.bf16.mxu0 %v1863_v49  ;;  %1894 = vmatprep.subr.bf16.mxu1 %v1863_v49 }
 0x700   : > { %1866 = vmatpush3.bf16.msra.mxu0 %v1863_v49  ;;  %1898 = vmatpush3.bf16.msra.mxu1 %v1863_v49 }
 0x701   : > { %v1451_v52 = vpop.permute.xlu0 %1450  ;;  %v1469_v54 = vpop.permute.xlu1 %1468 }
 0x703   : > { %1782 = vmatmul.mubr.msk.f32.vlgmr.msra.gmra.mrb[0].mxu0 %vm1336_vm7, %v1333_v40  ;;  %1785 = vmatmul.mubr.msk.f32.vlgmr.msra.gmra.mrb[0].mxu1 %vm1336_vm7, %v1335_v42 }
 0x705   : > { %v1474_v55 = vpop.permute.xlu0 %1473  ;;  %v1456_v56 = vpop.permute.xlu1 %1455 }
 0x709   : > { %v1479_v57 = vpop.permute.xlu0 %1478  ;;  %v1484_v58 = vpop.permute.xlu1 %1483 }
 0x70d   : > { %v1502_v4 = vpop.permute.xlu0 %1501  ;;  %v1507_v46 = vpop.permute.xlu1 %1506 }
 0x711   : > { %v1512_v14 = vpop.permute.xlu0 %1511  ;;  %v1517_v17 = vpop.permute.xlu1 %1516 }
 0x715   : > { %v1535_v25 = vpop.permute.xlu0 %1534 }
 0x7d6   : > { %v1783_v59 = vpop.f32.mrb[0].mxu0  ;;  %v1786_v26 = vpop.f32.mrb[0].mxu1 }
 0x7d7   : > { %v1459_v61 = vmul.f32 %v1783_v59, %v1446_v51  ;;  %v1461_v62 = vmul.f32 %v1786_v26, %v1456_v56  ;;  %v1415_v63 = vpop.f32.mrb[1].mxu0  ;;  %v1425_v0 = vpop.f32.mrb[1].mxu1 }
 0x7d8   : > { %v1458_v2 = vmul.f32 %v1441_v20, %v1415_v63  ;;  %v1460_v3 = vmul.f32 %v1451_v52, %v1425_v0 }
 0x7d9   : > { %v1487_v7 = vadd.f32 %v1474_v55, %v1459_v61  ;;  %v1489_v5 = vadd.f32 %v1484_v58, %v1461_v62 }
 0x7da   : > { %v1486_v8 = vadd.f32 %v1469_v54, %v1458_v2  ;;  %v1488_v9 = vadd.f32 %v1479_v57, %v1460_v3 }
 0x7db   : > { %v1491_v10 = vmax.f32 %v1487_v7, 0.0  ;;  %v1493_v13 = vmax.f32 %v1489_v5, 0.0 }
 0x7dc   : > { %v1490_v50 = vmax.f32 %v1486_v8, 0.0  ;;  %v1492_v11 = vmax.f32 %v1488_v9, 0.0 }
 0x7dd   : > { %v1520_v12 = vmul.f32 %v1507_v46, %v1491_v10  ;;  %v1522_v60 = vmul.f32 %v1517_v17, %v1493_v13 }
 0x7de   : > { %v1519_v53 = vmul.f32 %v1502_v4, %v1490_v50  ;;  %v1521_v16 = vmul.f32 %v1512_v14, %v1492_v11 }
 0x7e0   : > { %v1523_v15 = vadd.f32 %v1520_v12, %v1519_v53 }
 0x7e2   : > { %v1524_v18 = vadd.f32 %v1523_v15, %v1521_v16 }
 0x7e4   : > { %v1525_v19 = vadd.f32 %v1524_v18, %v1522_v60 }
 0x7e6   : > { %v1526_v21 = vrot.slane %v1525_v19, 4 }
 0x7e8   : > { %v1527_v22 = vadd.f32 %v1526_v21, %v1525_v19 }
 0x7ea   : > { %v1528_v37 = vrot.slane %v1527_v22, 2 }
 0x7ec   : > { %v1529_v35 = vadd.f32 %v1528_v37, %v1527_v22 }
 0x7ee   : > { %v1530_v23 = vrot.slane %v1529_v35, 1 }
 0x7f0   : > { %v1531_v24 = vadd.f32 %v1530_v23, %v1529_v35 }
 0x7f2   : > { %v1537_v1 = vadd.f32 %v1535_v25, %v1531_v24 }
 0x7f4   : > { %v1646_v27 = vmul.f32 -1.442695, %v1537_v1 }
 0x7f6   : > { %1965 = vpow2.f32 %v1646_v27 }
 0x800   : > { %v1966_v39 = vpop.eup %1965 }
 0x801   : > { %v1541_v41 = vadd.f32 1.0, %v1966_v39 }
 0x803   : > { %1967 = vrcp.f32 %v1541_v41 }
 0x80d   : > { %v1968_v28 = vpop.eup %1967 }
 0x80e   : > { %1544 = vst [vmem:[#allocation8] sm:$0x1] %v1968_v28 }
 0x80f PF: > { %p2572_p7 = scmp.eq.s32.totalorder %s1607_s18, 2  ;;  %s2028_s10 = smov [#allocation8]  }
 0x810   : > { %s1554_s11 = sshll.u32 %s2028_s10, 4  ;;  %s1555_s11 = int_to_ptr.vmem [resolvable:$true] %s1554_s11 }
 0x811   : > { %s1969_s12 = scalar_lea.vmem %s1555_s11, 16  ;;  %s1975_s13 = scalar_lea.vmem %s1555_s11, 32 }
 0x812   : > { %p1970_p8 = scmp.ne.s32.totalorder %s1555_s11, %s1969_s12  ;;  %p1976_p11 = scmp.lt.s32.totalorder %s1555_s11, %s1555_s11 }
 0x813   : > { %p1977_p12 = scmp.lt.s32.totalorder %s1975_s13, %s1969_s12 }
 0x814   : > { %p1971_p9 = pnand %p1970_p8, %p2572_p7 }
 0x815   : > { %p1978_p13 = por %p1977_p12, %p1976_p11 }
 0x816   : > { %p1972_p10 = pneg %p1971_p9 }
 0x818   : > { %p1979_p0 = pnand %p1978_p13, %p1972_p10 }
 0x81a   : > { %1982 = shalt.err (!%p1979_p0)
}
 0x81b   : > { %s1983_s20 = scalar_lea.hbm %s2611_s4, 16 }
 0x81c   : > { %p1984_p1 = scmp.ne.s32.totalorder %s2611_s4, %s1983_s20  ;;  %p1989_p4 = scmp.lt.u32.totalorder %s1983_s20, %s2611_s4 }
 0x81e   : > { %p1985_p2 = pnand %p1984_p1, %p2572_p7 }
 0x820   : > { %p1986_p3 = pneg %p1985_p2 }
 0x822   : > { %p1991_p5 = pnand %p1989_p4, %p1986_p3 }
 0x824   : > { %1994 = shalt.err (!%p1991_p5)
}
 0x825   : > { %1900 = dma.vmem_to_hbm [thread:$0]  (%p2572_p7), %s1555_s11, 16, %s2611_s4, [#allocation9]  }
 0x826   : > { %2008 = dma.done.wait (%p2572_p7), [#allocation9], 16  }
 0x827   : > { %2010 = vsyncadd (%p2572_p7), [#allocation9], 4294967280 }
 0x828 PF: > { %s15_s17 = sadd.s32 1, %s2021_s17   ;;  %s2615_s15 = smov %s2017_s16 }
 0x829   : > { %p12_p6 = scmp.ge.s32.totalorder %s15_s17, 5   ;;  %s2616_s16 = smov %s2618_s19 }
 0x82b   :  { %14 = sbr.rel (!%p12_p6) target bundleno = 2 (0x2), region = 92 }
 0x832   :  { %1567 = vsyncpa [#allocation9], 1 }
 0x833   :  { %1569 = vsyncpa [#allocation9 + $0x1], 1 }

</bundles_post_ra>
